<compile_context>
chip_gen: v5e
topology: v5e:2x2
jax: 0.10.0
libtpu: 0.0.40
codegen_flags: <defaults>
</compile_context>

<pallas_src>
import functools

import jax
import jax.numpy as jnp
from jax.experimental import pallas as pl
from jax.experimental.pallas import tpu as pltpu


def _decoder_lstm_kernel(*refs, seq_target: int, dim: int, zero_init: bool):
    if zero_init:
        (x_ref, wx_ref, wh_ref, b_ref, wblk_ref, o_ref, hy_hist_ref) = refs
    else:
        (x_ref, hx0_ref, cx0_ref, wx_ref, wh_ref, b_ref, wblk_ref,
         o_ref, hy_hist_ref) = refs

    F = dim
    four_f = 4 * F

    # ---- hoisted, paid once per row block -------------------------------
    # Lane-pattern constants for the fused full-width gate nonlinearity:
    #   sigmoid(z) = 0.5 * tanh(0.5 * z) + 0.5   (i / f / o lanes)
    #   tanh(z)    = 1.0 * tanh(1.0 * z) + 0.0   (g lanes)
    lane = jax.lax.broadcasted_iota(jnp.int32, (1, four_f), 1)
    is_g = jnp.logical_and(lane >= 2 * F, lane < 3 * F)
    scale = jnp.where(is_g, 1.0, 0.5).astype(jnp.float32)      # pre & post scale
    offset = jnp.where(is_g, 0.0, 0.5).astype(jnp.float32)     # post offset

    x = x_ref[...]                                              # (tm, F), constant in t
    # x @ Wx + b hoisted out of the recurrence; fold the tanh pre-scale into
    # gx and Wh once so the loop body has no extra per-step multiply.
    gx = jnp.dot(x, wx_ref[...], preferred_element_type=jnp.float32) + b_ref[...]
    gx_s = gx * scale                                           # (tm, 4F)
    wh_s = wh_ref[...] * scale                                  # (F, 4F)

    def activate(pre_act):
        # ONE full-lane-width (tm, 4F) tanh for all four gates.
        t_all = jnp.tanh(pre_act)
        acts = t_all * scale + offset
        return (acts[:, 0 * F:1 * F],     # ingate   (sigmoid)
                acts[:, 1 * F:2 * F],     # forget   (sigmoid)
                acts[:, 2 * F:3 * F],     # cellgate (tanh)
                acts[:, 3 * F:4 * F])     # outgate  (sigmoid)

    # ---- recurrence (fully unrolled; seq_target is static) ----------------
    if zero_init:
        # t = 0 with hx = cx = 0: skip the hx@Wh matmul and the forget term.
        i0, _f0, g0, o0 = activate(gx_s)
        cx = i0 * g0
        hx = o0 * jnp.tanh(cx)
        hy_hist_ref[:, pl.ds(0, F)] = hx
        t_start = 1
    else:
        hx = hx0_ref[...]
        cx = cx0_ref[...]
        t_start = 0

    for t in range(t_start, seq_target):
        pre_act = gx_s + jnp.dot(hx, wh_s, preferred_element_type=jnp.float32)
        ig, fg, gg, og = activate(pre_act)
        cy = fg * cx + ig * gg
        hy = og * jnp.tanh(cy)
        hy_hist_ref[:, pl.ds(t * F, F)] = hy     # static lane slab, off the dep chain
        hx, cx = hy, cy

    # ---- epilogue: one dense matmul + one full-width sigmoid + one store --
    # wblk = kron(I_T, W_edge): lanes [t*F:(t+1)*F) of z equal hy_t @ W_edge.
    z = jnp.dot(hy_hist_ref[...], wblk_ref[...],
                preferred_element_type=jnp.float32)              # (tm, T*F)
    y = 0.5 * jnp.tanh(0.5 * z) + 0.5                            # sigmoid, lane-dense
    o_ref[...] = y.astype(o_ref.dtype)                           # unmasked (tm, T*F) store


def decoder_lstm(inputs_edge, W_gate, b_gate, W_edge, *, seq_target,
                 hidden_state_edge=None, block_m=256):
    """inputs_edge: (B, N, F) float32. Returns (seq_target, B, N, F) float32."""
    B, N, F = inputs_edge.shape
    M = B * N
    T = seq_target
    zero_init = hidden_state_edge is None

    x = inputs_edge.reshape(M, F).astype(jnp.float32)

    # nn.Linear: gates = [x, hx] @ W_gate^T + b_gate, W_gate: (4F, 2F)
    Wt = W_gate.T.astype(jnp.float32)                 # (2F, 4F)
    Wx = Wt[:F, :]                                    # acts on x
    Wh = Wt[F:, :]                                    # acts on hx
    b = b_gate.reshape(1, 4 * F).astype(jnp.float32)
    # Block-diagonal edge projection so the epilogue is a single K/N-dense
    # matmul producing the lane-dense (tm, T*F) output tile directly.
    W_blk = jnp.kron(jnp.eye(T, dtype=jnp.float32), W_edge.astype(jnp.float32))  # (T*F, T*F)
    # TODO(synk): self.b_edge exists in the PyTorch __init__ but is unused in forward -> omitted.

    # ---- row tiling over M = B*N (rows are independent) --------------------
    tm = min(block_m, M)
    assert M % tm == 0, "M = B*N must be divisible by the row tile"
    assert tm % 8 == 0 or tm == M, "row tile must be sublane-aligned"

    def _vmem_bytes(tile_m):
        tf = T * F
        bytes_ = 4 * (2 * tile_m * F            # x (double-buffered)
                      + 2 * 2 * F * 4 * F       # Wx, Wh
                      + 2 * 4 * F               # bias
                      + 2 * tf * tf             # W_blk
                      + 2 * tile_m * tf         # output block
                      + tile_m * tf)            # hy history scratch
        if not zero_init:
            bytes_ += 4 * (2 * 2 * tile_m * F)  # hx0, cx0
        return bytes_

    # VMEM guard (v7x has 64 MiB physical / 32 MiB default scoped limit).
    while (_vmem_bytes(tm) > (12 << 20) and tm >= 16
           and M % (tm // 2) == 0 and (tm // 2) % 8 == 0):
        tm //= 2
    grid = (M // tm,)

    in_specs = [pl.BlockSpec((tm, F), lambda i: (i, 0))]                   # x
    args = [x]
    if not zero_init:
        hx0 = hidden_state_edge[0].reshape(M, F).astype(jnp.float32)
        cx0 = hidden_state_edge[1].reshape(M, F).astype(jnp.float32)
        in_specs += [pl.BlockSpec((tm, F), lambda i: (i, 0)),              # hx0
                     pl.BlockSpec((tm, F), lambda i: (i, 0))]              # cx0
        args += [hx0, cx0]
    in_specs += [
        pl.BlockSpec((F, 4 * F), lambda i: (0, 0)),                        # Wx
        pl.BlockSpec((F, 4 * F), lambda i: (0, 0)),                        # Wh
        pl.BlockSpec((1, 4 * F), lambda i: (0, 0)),                        # bias
        pl.BlockSpec((T * F, T * F), lambda i: (0, 0)),                    # W_blk
    ]
    args += [Wx, Wh, b, W_blk]

    grid_spec = pltpu.PrefetchScalarGridSpec(
        num_scalar_prefetch=0,
        grid=grid,
        in_specs=in_specs,
        out_specs=pl.BlockSpec((tm, T * F), lambda i: (i, 0)),
        scratch_shapes=[pltpu.VMEM((tm, T * F), jnp.float32)],
    )

    out = pl.pallas_call(
        functools.partial(_decoder_lstm_kernel, seq_target=T, dim=F,
                          zero_init=zero_init),
        out_shape=jax.ShapeDtypeStruct((M, T * F), jnp.float32),
        grid_spec=grid_spec,
        compiler_params=pltpu.CompilerParams(
            dimension_semantics=("parallel",),
            vmem_limit_bytes=32 * 1024 * 1024),
    )(*args)

    # Layout plumbing outside the kernel: (M, T*F) -> (T, B, N, F).
    return jnp.transpose(out.reshape(B, N, T, F), (2, 0, 1, 3))


def _reference(inputs_edge, W_gate, b_gate, W_edge, seq_target, hidden_state=None):
    """Pure-JAX reference mirroring the PyTorch forward."""
    B, N, F = inputs_edge.shape
    if hidden_state is None:
        hx = jnp.zeros((B, N, F), jnp.float32)
        cx = jnp.zeros((B, N, F), jnp.float32)
    else:
        hx, cx = hidden_state
    outs = []
    for _ in range(seq_target):
        combined = jnp.concatenate([inputs_edge, hx], axis=2)        # (B,N,2F)
        gates = combined @ W_gate.T + b_gate                         # (B,N,4F)
        i, f, g, o = jnp.split(gates, 4, axis=2)
        i, f, g, o = jax.nn.sigmoid(i), jax.nn.sigmoid(f), jnp.tanh(g), jax.nn.sigmoid(o)
        cy = f * cx + i * g
        hy = o * jnp.tanh(cy)
        yt = jax.nn.sigmoid(hy @ W_edge)
        outs.append(yt)
        hx, cx = hy, cy
    return jnp.stack(outs)


if __name__ == "__main__":
    # Small shapes consistent with the module: B=2 batch, N=16 vertices,
    # F=dim_in_edge=32 features, seq_target=8 decode steps.
    B, N, F = 2, 16, 32
    seq_target = 8

    key = jax.random.PRNGKey(0)
    k_x, k_wg, k_bg, k_we, k_h, k_c = jax.random.split(key, 6)

    inputs_edge = jax.random.normal(k_x, (B, N, F), jnp.float32)
    W_gate = jax.random.normal(k_wg, (4 * F, 2 * F), jnp.float32) * 0.1  # nn.Linear weight
    b_gate = jax.random.normal(k_bg, (4 * F,), jnp.float32) * 0.1        # nn.Linear bias
    W_edge = jax.random.normal(k_we, (F, F), jnp.float32) * 0.1          # self.W_edge

    # Default zero-initial-state path.
    out = decoder_lstm(inputs_edge, W_gate, b_gate, W_edge, seq_target=seq_target)
    out = jax.block_until_ready(out)
    ref = _reference(inputs_edge, W_gate, b_gate, W_edge, seq_target)
    assert out.shape == (seq_target, B, N, F)
    assert jnp.allclose(out, ref, atol=1e-5, rtol=1e-5)

    # Provided-initial-state path (now also checked against the reference).
    hx0 = jax.random.normal(k_h, (B, N, F), jnp.float32) * 0.5
    cx0 = jax.random.normal(k_c, (B, N, F), jnp.float32) * 0.5
    out2 = decoder_lstm(inputs_edge, W_gate, b_gate, W_edge, seq_target=seq_target,
                        hidden_state_edge=(hx0, cx0))
    out2 = jax.block_until_ready(out2)
    ref2 = _reference(inputs_edge, W_gate, b_gate, W_edge, seq_target,
                      hidden_state=(hx0, cx0))
    assert jnp.allclose(out2, ref2, atol=1e-5, rtol=1e-5)

    print("KERNEL_OK")
</pallas_src>

<mosaic_0001>
module attributes {stable_mosaic.version = 11 : i64} {
  func.func @_decoder_lstm_kernel(%arg0: i32, %arg1: memref<32x32xf32, #tpu.memory_space<vmem>>, %arg2: memref<32x128xf32, #tpu.memory_space<vmem>>, %arg3: memref<32x128xf32, #tpu.memory_space<vmem>>, %arg4: memref<1x128xf32, #tpu.memory_space<vmem>>, %arg5: memref<256x256xf32, #tpu.memory_space<vmem>>, %arg6: memref<32x256xf32, #tpu.memory_space<vmem>>, %arg7: memref<32x256xf32, #tpu.memory_space<vmem>>) attributes {dimension_semantics = [#tpu.dimension_semantics<parallel>], iteration_bounds = array<i64: 1>, scalar_prefetch = 0 : i64, scratch_operands = 1 : i64, tpu.core_type = #tpu.core_type<tc>, window_params = [{transform_indices = @transform_0, window_bounds = array<i64: 32, 32>}, {pipeline_mode = #tpu.pipeline_mode<synchronous>, transform_indices = @transform_1, window_bounds = array<i64: 32, 128>}, {pipeline_mode = #tpu.pipeline_mode<synchronous>, transform_indices = @transform_2, window_bounds = array<i64: 32, 128>}, {pipeline_mode = #tpu.pipeline_mode<synchronous>, transform_indices = @transform_3, window_bounds = array<i64: 1, 128>}, {pipeline_mode = #tpu.pipeline_mode<synchronous>, transform_indices = @transform_4, window_bounds = array<i64: 256, 256>}, {transform_indices = @transform_5, window_bounds = array<i64: 32, 256>}]} {
    %0 = tpu.iota {dimensions = array<i32: 1>} : vector<1x128xi32>
    %c64_i32 = arith.constant 64 : i32
    %1 = vector.broadcast %c64_i32 : i32 to vector<1x128xi32>
    %2 = arith.cmpi sge, %0, %1 : vector<1x128xi32>
    %c96_i32 = arith.constant 96 : i32
    %3 = vector.broadcast %c96_i32 : i32 to vector<1x128xi32>
    %4 = arith.cmpi slt, %0, %3 : vector<1x128xi32>
    %5 = arith.andi %2, %4 : vector<1x128xi1>
    %cst = arith.constant 1.000000e+00 : f32
    %cst_0 = arith.constant 5.000000e-01 : f32
    %6 = vector.broadcast %cst : f32 to vector<1x128xf32>
    %7 = vector.broadcast %cst_0 : f32 to vector<1x128xf32>
    %8 = arith.select %5, %6, %7 : vector<1x128xi1>, vector<1x128xf32>
    %cst_1 = arith.constant 0.000000e+00 : f32
    %cst_2 = arith.constant 5.000000e-01 : f32
    %9 = vector.broadcast %cst_1 : f32 to vector<1x128xf32>
    %10 = vector.broadcast %cst_2 : f32 to vector<1x128xf32>
    %11 = arith.select %5, %9, %10 : vector<1x128xi1>, vector<1x128xf32>
    %c0 = arith.constant 0 : index
    %c0_3 = arith.constant 0 : index
    %12 = vector.load %arg1[%c0, %c0_3] : memref<32x32xf32, #tpu.memory_space<vmem>>, vector<32x32xf32>
    %c0_4 = arith.constant 0 : index
    %c0_5 = arith.constant 0 : index
    %13 = vector.load %arg2[%c0_4, %c0_5] : memref<32x128xf32, #tpu.memory_space<vmem>>, vector<32x128xf32>
    %cst_6 = arith.constant dense<0.000000e+00> : vector<32x128xf32>
    %14 = tpu.matmul %12, %13, %cst_6 {dimension_numbers = #tpu.dot_dimension_numbers<[1], [0], [0], [1], [0, 0, 1, 1], [], []>} : vector<32x32xf32>, vector<32x128xf32>, vector<32x128xf32> -> vector<32x128xf32>
    %c0_7 = arith.constant 0 : index
    %c0_8 = arith.constant 0 : index
    %15 = vector.load %arg4[%c0_7, %c0_8] : memref<1x128xf32, #tpu.memory_space<vmem>>, vector<1x128xf32>
    %16 = vector.broadcast %15 : vector<1x128xf32> to vector<32x128xf32>
    %17 = arith.addf %14, %16 : vector<32x128xf32>
    %18 = vector.broadcast %8 : vector<1x128xf32> to vector<32x128xf32>
    %19 = arith.mulf %17, %18 : vector<32x128xf32>
    %c0_9 = arith.constant 0 : index
    %c0_10 = arith.constant 0 : index
    %20 = vector.load %arg3[%c0_9, %c0_10] : memref<32x128xf32, #tpu.memory_space<vmem>>, vector<32x128xf32>
    %21 = vector.broadcast %8 : vector<1x128xf32> to vector<32x128xf32>
    %22 = arith.mulf %20, %21 : vector<32x128xf32>
    %23 = math.tanh %19 : vector<32x128xf32>
    %24 = vector.broadcast %8 : vector<1x128xf32> to vector<32x128xf32>
    %25 = arith.mulf %23, %24 : vector<32x128xf32>
    %26 = vector.broadcast %11 : vector<1x128xf32> to vector<32x128xf32>
    %27 = arith.addf %25, %26 : vector<32x128xf32>
    %28 = vector.extract_strided_slice %27 {offsets = [0, 0], sizes = [32, 32], strides = [1, 1]} : vector<32x128xf32> to vector<32x32xf32>
    %29 = vector.extract_strided_slice %27 {offsets = [0, 64], sizes = [32, 32], strides = [1, 1]} : vector<32x128xf32> to vector<32x32xf32>
    %30 = vector.extract_strided_slice %27 {offsets = [0, 96], sizes = [32, 32], strides = [1, 1]} : vector<32x128xf32> to vector<32x32xf32>
    %31 = arith.mulf %28, %29 : vector<32x32xf32>
    %32 = math.tanh %31 : vector<32x32xf32>
    %33 = arith.mulf %30, %32 : vector<32x32xf32>
    %c0_11 = arith.constant 0 : index
    %c0_12 = arith.constant 0 : index
    %34 = vector.load %arg7[%c0_11, %c0_12] : memref<32x256xf32, #tpu.memory_space<vmem>>, vector<32x32xf32>
    tpu.vector_store %arg7[%c0_11, %c0_12], %33 {strides = array<i32>} : memref<32x256xf32, #tpu.memory_space<vmem>>, vector<32x32xf32>,
    %cst_13 = arith.constant dense<0.000000e+00> : vector<32x128xf32>
    %35 = tpu.matmul %33, %22, %cst_13 {dimension_numbers = #tpu.dot_dimension_numbers<[1], [0], [0], [1], [0, 0, 1, 1], [], []>} : vector<32x32xf32>, vector<32x128xf32>, vector<32x128xf32> -> vector<32x128xf32>
    %36 = arith.addf %19, %35 : vector<32x128xf32>
    %37 = math.tanh %36 : vector<32x128xf32>
    %38 = vector.broadcast %8 : vector<1x128xf32> to vector<32x128xf32>
    %39 = arith.mulf %37, %38 : vector<32x128xf32>
    %40 = vector.broadcast %11 : vector<1x128xf32> to vector<32x128xf32>
    %41 = arith.addf %39, %40 : vector<32x128xf32>
    %42 = vector.extract_strided_slice %41 {offsets = [0, 0], sizes = [32, 32], strides = [1, 1]} : vector<32x128xf32> to vector<32x32xf32>
    %43 = vector.extract_strided_slice %41 {offsets = [0, 32], sizes = [32, 32], strides = [1, 1]} : vector<32x128xf32> to vector<32x32xf32>
    %44 = vector.extract_strided_slice %41 {offsets = [0, 64], sizes = [32, 32], strides = [1, 1]} : vector<32x128xf32> to vector<32x32xf32>
    %45 = vector.extract_strided_slice %41 {offsets = [0, 96], sizes = [32, 32], strides = [1, 1]} : vector<32x128xf32> to vector<32x32xf32>
    %46 = arith.mulf %43, %31 : vector<32x32xf32>
    %47 = arith.mulf %42, %44 : vector<32x32xf32>
    %48 = arith.addf %46, %47 : vector<32x32xf32>
    %49 = math.tanh %48 : vector<32x32xf32>
    %50 = arith.mulf %45, %49 : vector<32x32xf32>
    %c0_14 = arith.constant 0 : index
    %c32 = arith.constant 32 : index
    %51 = vector.load %arg7[%c0_14, %c32] : memref<32x256xf32, #tpu.memory_space<vmem>>, vector<32x32xf32>
    tpu.vector_store %arg7[%c0_14, %c32], %50 {strides = array<i32>} : memref<32x256xf32, #tpu.memory_space<vmem>>, vector<32x32xf32>,
    %cst_15 = arith.constant dense<0.000000e+00> : vector<32x128xf32>
    %52 = tpu.matmul %50, %22, %cst_15 {dimension_numbers = #tpu.dot_dimension_numbers<[1], [0], [0], [1], [0, 0, 1, 1], [], []>} : vector<32x32xf32>, vector<32x128xf32>, vector<32x128xf32> -> vector<32x128xf32>
    %53 = arith.addf %19, %52 : vector<32x128xf32>
    %54 = math.tanh %53 : vector<32x128xf32>
    %55 = vector.broadcast %8 : vector<1x128xf32> to vector<32x128xf32>
    %56 = arith.mulf %54, %55 : vector<32x128xf32>
    %57 = vector.broadcast %11 : vector<1x128xf32> to vector<32x128xf32>
    %58 = arith.addf %56, %57 : vector<32x128xf32>
    %59 = vector.extract_strided_slice %58 {offsets = [0, 0], sizes = [32, 32], strides = [1, 1]} : vector<32x128xf32> to vector<32x32xf32>
    %60 = vector.extract_strided_slice %58 {offsets = [0, 32], sizes = [32, 32], strides = [1, 1]} : vector<32x128xf32> to vector<32x32xf32>
    %61 = vector.extract_strided_slice %58 {offsets = [0, 64], sizes = [32, 32], strides = [1, 1]} : vector<32x128xf32> to vector<32x32xf32>
    %62 = vector.extract_strided_slice %58 {offsets = [0, 96], sizes = [32, 32], strides = [1, 1]} : vector<32x128xf32> to vector<32x32xf32>
    %63 = arith.mulf %60, %48 : vector<32x32xf32>
    %64 = arith.mulf %59, %61 : vector<32x32xf32>
    %65 = arith.addf %63, %64 : vector<32x32xf32>
    %66 = math.tanh %65 : vector<32x32xf32>
    %67 = arith.mulf %62, %66 : vector<32x32xf32>
    %c0_16 = arith.constant 0 : index
    %c64 = arith.constant 64 : index
    %68 = vector.load %arg7[%c0_16, %c64] : memref<32x256xf32, #tpu.memory_space<vmem>>, vector<32x32xf32>
    tpu.vector_store %arg7[%c0_16, %c64], %67 {strides = array<i32>} : memref<32x256xf32, #tpu.memory_space<vmem>>, vector<32x32xf32>,
    %cst_17 = arith.constant dense<0.000000e+00> : vector<32x128xf32>
    %69 = tpu.matmul %67, %22, %cst_17 {dimension_numbers = #tpu.dot_dimension_numbers<[1], [0], [0], [1], [0, 0, 1, 1], [], []>} : vector<32x32xf32>, vector<32x128xf32>, vector<32x128xf32> -> vector<32x128xf32>
    %70 = arith.addf %19, %69 : vector<32x128xf32>
    %71 = math.tanh %70 : vector<32x128xf32>
    %72 = vector.broadcast %8 : vector<1x128xf32> to vector<32x128xf32>
    %73 = arith.mulf %71, %72 : vector<32x128xf32>
    %74 = vector.broadcast %11 : vector<1x128xf32> to vector<32x128xf32>
    %75 = arith.addf %73, %74 : vector<32x128xf32>
    %76 = vector.extract_strided_slice %75 {offsets = [0, 0], sizes = [32, 32], strides = [1, 1]} : vector<32x128xf32> to vector<32x32xf32>
    %77 = vector.extract_strided_slice %75 {offsets = [0, 32], sizes = [32, 32], strides = [1, 1]} : vector<32x128xf32> to vector<32x32xf32>
    %78 = vector.extract_strided_slice %75 {offsets = [0, 64], sizes = [32, 32], strides = [1, 1]} : vector<32x128xf32> to vector<32x32xf32>
    %79 = vector.extract_strided_slice %75 {offsets = [0, 96], sizes = [32, 32], strides = [1, 1]} : vector<32x128xf32> to vector<32x32xf32>
    %80 = arith.mulf %77, %65 : vector<32x32xf32>
    %81 = arith.mulf %76, %78 : vector<32x32xf32>
    %82 = arith.addf %80, %81 : vector<32x32xf32>
    %83 = math.tanh %82 : vector<32x32xf32>
    %84 = arith.mulf %79, %83 : vector<32x32xf32>
    %c0_18 = arith.constant 0 : index
    %c96 = arith.constant 96 : index
    %85 = vector.load %arg7[%c0_18, %c96] : memref<32x256xf32, #tpu.memory_space<vmem>>, vector<32x32xf32>
    tpu.vector_store %arg7[%c0_18, %c96], %84 {strides = array<i32>} : memref<32x256xf32, #tpu.memory_space<vmem>>, vector<32x32xf32>,
    %cst_19 = arith.constant dense<0.000000e+00> : vector<32x128xf32>
    %86 = tpu.matmul %84, %22, %cst_19 {dimension_numbers = #tpu.dot_dimension_numbers<[1], [0], [0], [1], [0, 0, 1, 1], [], []>} : vector<32x32xf32>, vector<32x128xf32>, vector<32x128xf32> -> vector<32x128xf32>
    %87 = arith.addf %19, %86 : vector<32x128xf32>
    %88 = math.tanh %87 : vector<32x128xf32>
    %89 = vector.broadcast %8 : vector<1x128xf32> to vector<32x128xf32>
    %90 = arith.mulf %88, %89 : vector<32x128xf32>
    %91 = vector.broadcast %11 : vector<1x128xf32> to vector<32x128xf32>
    %92 = arith.addf %90, %91 : vector<32x128xf32>
    %93 = vector.extract_strided_slice %92 {offsets = [0, 0], sizes = [32, 32], strides = [1, 1]} : vector<32x128xf32> to vector<32x32xf32>
    %94 = vector.extract_strided_slice %92 {offsets = [0, 32], sizes = [32, 32], strides = [1, 1]} : vector<32x128xf32> to vector<32x32xf32>
    %95 = vector.extract_strided_slice %92 {offsets = [0, 64], sizes = [32, 32], strides = [1, 1]} : vector<32x128xf32> to vector<32x32xf32>
    %96 = vector.extract_strided_slice %92 {offsets = [0, 96], sizes = [32, 32], strides = [1, 1]} : vector<32x128xf32> to vector<32x32xf32>
    %97 = arith.mulf %94, %82 : vector<32x32xf32>
    %98 = arith.mulf %93, %95 : vector<32x32xf32>
    %99 = arith.addf %97, %98 : vector<32x32xf32>
    %100 = math.tanh %99 : vector<32x32xf32>
    %101 = arith.mulf %96, %100 : vector<32x32xf32>
    %c0_20 = arith.constant 0 : index
    %c128 = arith.constant 128 : index
    %102 = vector.load %arg7[%c0_20, %c128] : memref<32x256xf32, #tpu.memory_space<vmem>>, vector<32x32xf32>
    tpu.vector_store %arg7[%c0_20, %c128], %101 {strides = array<i32>} : memref<32x256xf32, #tpu.memory_space<vmem>>, vector<32x32xf32>,
    %cst_21 = arith.constant dense<0.000000e+00> : vector<32x128xf32>
    %103 = tpu.matmul %101, %22, %cst_21 {dimension_numbers = #tpu.dot_dimension_numbers<[1], [0], [0], [1], [0, 0, 1, 1], [], []>} : vector<32x32xf32>, vector<32x128xf32>, vector<32x128xf32> -> vector<32x128xf32>
    %104 = arith.addf %19, %103 : vector<32x128xf32>
    %105 = math.tanh %104 : vector<32x128xf32>
    %106 = vector.broadcast %8 : vector<1x128xf32> to vector<32x128xf32>
    %107 = arith.mulf %105, %106 : vector<32x128xf32>
    %108 = vector.broadcast %11 : vector<1x128xf32> to vector<32x128xf32>
    %109 = arith.addf %107, %108 : vector<32x128xf32>
    %110 = vector.extract_strided_slice %109 {offsets = [0, 0], sizes = [32, 32], strides = [1, 1]} : vector<32x128xf32> to vector<32x32xf32>
    %111 = vector.extract_strided_slice %109 {offsets = [0, 32], sizes = [32, 32], strides = [1, 1]} : vector<32x128xf32> to vector<32x32xf32>
    %112 = vector.extract_strided_slice %109 {offsets = [0, 64], sizes = [32, 32], strides = [1, 1]} : vector<32x128xf32> to vector<32x32xf32>
    %113 = vector.extract_strided_slice %109 {offsets = [0, 96], sizes = [32, 32], strides = [1, 1]} : vector<32x128xf32> to vector<32x32xf32>
    %114 = arith.mulf %111, %99 : vector<32x32xf32>
    %115 = arith.mulf %110, %112 : vector<32x32xf32>
    %116 = arith.addf %114, %115 : vector<32x32xf32>
    %117 = math.tanh %116 : vector<32x32xf32>
    %118 = arith.mulf %113, %117 : vector<32x32xf32>
    %c0_22 = arith.constant 0 : index
    %c160 = arith.constant 160 : index
    %119 = vector.load %arg7[%c0_22, %c160] : memref<32x256xf32, #tpu.memory_space<vmem>>, vector<32x32xf32>
    tpu.vector_store %arg7[%c0_22, %c160], %118 {strides = array<i32>} : memref<32x256xf32, #tpu.memory_space<vmem>>, vector<32x32xf32>,
    %cst_23 = arith.constant dense<0.000000e+00> : vector<32x128xf32>
    %120 = tpu.matmul %118, %22, %cst_23 {dimension_numbers = #tpu.dot_dimension_numbers<[1], [0], [0], [1], [0, 0, 1, 1], [], []>} : vector<32x32xf32>, vector<32x128xf32>, vector<32x128xf32> -> vector<32x128xf32>
    %121 = arith.addf %19, %120 : vector<32x128xf32>
    %122 = math.tanh %121 : vector<32x128xf32>
    %123 = vector.broadcast %8 : vector<1x128xf32> to vector<32x128xf32>
    %124 = arith.mulf %122, %123 : vector<32x128xf32>
    %125 = vector.broadcast %11 : vector<1x128xf32> to vector<32x128xf32>
    %126 = arith.addf %124, %125 : vector<32x128xf32>
    %127 = vector.extract_strided_slice %126 {offsets = [0, 0], sizes = [32, 32], strides = [1, 1]} : vector<32x128xf32> to vector<32x32xf32>
    %128 = vector.extract_strided_slice %126 {offsets = [0, 32], sizes = [32, 32], strides = [1, 1]} : vector<32x128xf32> to vector<32x32xf32>
    %129 = vector.extract_strided_slice %126 {offsets = [0, 64], sizes = [32, 32], strides = [1, 1]} : vector<32x128xf32> to vector<32x32xf32>
    %130 = vector.extract_strided_slice %126 {offsets = [0, 96], sizes = [32, 32], strides = [1, 1]} : vector<32x128xf32> to vector<32x32xf32>
    %131 = arith.mulf %128, %116 : vector<32x32xf32>
    %132 = arith.mulf %127, %129 : vector<32x32xf32>
    %133 = arith.addf %131, %132 : vector<32x32xf32>
    %134 = math.tanh %133 : vector<32x32xf32>
    %135 = arith.mulf %130, %134 : vector<32x32xf32>
    %c0_24 = arith.constant 0 : index
    %c192 = arith.constant 192 : index
    %136 = vector.load %arg7[%c0_24, %c192] : memref<32x256xf32, #tpu.memory_space<vmem>>, vector<32x32xf32>
    tpu.vector_store %arg7[%c0_24, %c192], %135 {strides = array<i32>} : memref<32x256xf32, #tpu.memory_space<vmem>>, vector<32x32xf32>,
    %cst_25 = arith.constant dense<0.000000e+00> : vector<32x128xf32>
    %137 = tpu.matmul %135, %22, %cst_25 {dimension_numbers = #tpu.dot_dimension_numbers<[1], [0], [0], [1], [0, 0, 1, 1], [], []>} : vector<32x32xf32>, vector<32x128xf32>, vector<32x128xf32> -> vector<32x128xf32>
    %138 = arith.addf %19, %137 : vector<32x128xf32>
    %139 = math.tanh %138 : vector<32x128xf32>
    %140 = vector.broadcast %8 : vector<1x128xf32> to vector<32x128xf32>
    %141 = arith.mulf %139, %140 : vector<32x128xf32>
    %142 = vector.broadcast %11 : vector<1x128xf32> to vector<32x128xf32>
    %143 = arith.addf %141, %142 : vector<32x128xf32>
    %144 = vector.extract_strided_slice %143 {offsets = [0, 0], sizes = [32, 32], strides = [1, 1]} : vector<32x128xf32> to vector<32x32xf32>
    %145 = vector.extract_strided_slice %143 {offsets = [0, 32], sizes = [32, 32], strides = [1, 1]} : vector<32x128xf32> to vector<32x32xf32>
    %146 = vector.extract_strided_slice %143 {offsets = [0, 64], sizes = [32, 32], strides = [1, 1]} : vector<32x128xf32> to vector<32x32xf32>
    %147 = vector.extract_strided_slice %143 {offsets = [0, 96], sizes = [32, 32], strides = [1, 1]} : vector<32x128xf32> to vector<32x32xf32>
    %148 = arith.mulf %145, %133 : vector<32x32xf32>
    %149 = arith.mulf %144, %146 : vector<32x32xf32>
    %150 = arith.addf %148, %149 : vector<32x32xf32>
    %151 = math.tanh %150 : vector<32x32xf32>
    %152 = arith.mulf %147, %151 : vector<32x32xf32>
    %c0_26 = arith.constant 0 : index
    %c224 = arith.constant 224 : index
    %153 = vector.load %arg7[%c0_26, %c224] : memref<32x256xf32, #tpu.memory_space<vmem>>, vector<32x32xf32>
    tpu.vector_store %arg7[%c0_26, %c224], %152 {strides = array<i32>} : memref<32x256xf32, #tpu.memory_space<vmem>>, vector<32x32xf32>,
    %c0_27 = arith.constant 0 : index
    %c0_28 = arith.constant 0 : index
    %154 = vector.load %arg7[%c0_27, %c0_28] : memref<32x256xf32, #tpu.memory_space<vmem>>, vector<32x256xf32>
    %c0_29 = arith.constant 0 : index
    %c0_30 = arith.constant 0 : index
    %155 = vector.load %arg5[%c0_29, %c0_30] : memref<256x256xf32, #tpu.memory_space<vmem>>, vector<256x256xf32>
    %cst_31 = arith.constant dense<0.000000e+00> : vector<32x256xf32>
    %156 = tpu.matmul %154, %155, %cst_31 {dimension_numbers = #tpu.dot_dimension_numbers<[1], [0], [0], [1], [0, 0, 1, 1], [], []>} : vector<32x256xf32>, vector<256x256xf32>, vector<32x256xf32> -> vector<32x256xf32>
    %cst_32 = arith.constant 5.000000e-01 : f32
    %157 = vector.broadcast %cst_32 : f32 to vector<32x256xf32>
    %158 = arith.mulf %157, %156 : vector<32x256xf32>
    %159 = math.tanh %158 : vector<32x256xf32>
    %cst_33 = arith.constant 5.000000e-01 : f32
    %160 = vector.broadcast %cst_33 : f32 to vector<32x256xf32>
    %161 = arith.mulf %160, %159 : vector<32x256xf32>
    %cst_34 = arith.constant 5.000000e-01 : f32
    %162 = vector.broadcast %cst_34 : f32 to vector<32x256xf32>
    %163 = arith.addf %161, %162 : vector<32x256xf32>
    %c0_35 = arith.constant 0 : index
    %c0_36 = arith.constant 0 : index
    %164 = vector.load %arg6[%c0_35, %c0_36] : memref<32x256xf32, #tpu.memory_space<vmem>>, vector<32x256xf32>
    tpu.vector_store %arg6[%c0_35, %c0_36], %163 {strides = array<i32>} : memref<32x256xf32, #tpu.memory_space<vmem>>, vector<32x256xf32>,
    return
  }
  func.func @transform_0(%arg0: i32) -> (i32, i32) {
    %c0_i32 = arith.constant 0 : i32
    %c0_i32_0 = arith.constant 0 : i32
    return %arg0, %c0_i32 : i32, i32
  }
  func.func @transform_1(%arg0: i32) -> (i32, i32) {
    %c0_i32 = arith.constant 0 : i32
    %c0_i32_0 = arith.constant 0 : i32
    %c0_i32_1 = arith.constant 0 : i32
    return %c0_i32, %c0_i32_0 : i32, i32
  }
  func.func @transform_2(%arg0: i32) -> (i32, i32) {
    %c0_i32 = arith.constant 0 : i32
    %c0_i32_0 = arith.constant 0 : i32
    %c0_i32_1 = arith.constant 0 : i32
    return %c0_i32, %c0_i32_0 : i32, i32
  }
  func.func @transform_3(%arg0: i32) -> (i32, i32) {
    %c0_i32 = arith.constant 0 : i32
    %c0_i32_0 = arith.constant 0 : i32
    %c0_i32_1 = arith.constant 0 : i32
    return %c0_i32, %c0_i32_0 : i32, i32
  }
  func.func @transform_4(%arg0: i32) -> (i32, i32) {
    %c0_i32 = arith.constant 0 : i32
    %c0_i32_0 = arith.constant 0 : i32
    %c0_i32_1 = arith.constant 0 : i32
    return %c0_i32, %c0_i32_0 : i32, i32
  }
  func.func @transform_5(%arg0: i32) -> (i32, i32) {
    %c0_i32 = arith.constant 0 : i32
    %c0_i32_0 = arith.constant 0 : i32
    return %arg0, %c0_i32 : i32, i32
  }
}

</mosaic_0001>

<bundles_post_ra>
// kernel: tpu_custom_call.1
= control target key start
LH: loop header
LB: loop body
LE: loop exit
PB: predicated region body
PF: predicated region fallthrough
CT: control target
= control target key end

     0   :  { %10 = vsyncpa [#allocation4], 0  ;;  %s2435_s0 = inlined_call_operand.hbm [shape: f32[32,32], index: 0, kind: input, shape index: {}]   ;;  %s2436_s1 = inlined_call_operand.hbm [shape: f32[32,128], index: 1, kind: input, shape index: {}]   ;;  %s2437_s2 = inlined_call_operand.hbm [shape: f32[32,128], index: 2, kind: input, shape index: {}]   ;;  %s2438_s3 = inlined_call_operand.vmem [shape: f32[1,128], index: 3, kind: input, shape index: {}]   ;;  %s2439_s4 = inlined_call_operand.hbm [shape: f32[256,256], index: 4, kind: input, shape index: {}]   ;;  %s2440_s5 = inlined_call_operand.hbm [shape: f32[32,256], index: 5, kind: output, shape index: {}]  }
   0x1   :  { %11 = vsyncpa [#allocation7], 0 }
   0x2   :  { %12 = vsyncpa [#allocation10], 0 }
   0x3   :  { %13 = vsyncpa [#allocation5], 0  ;;  %s31_s20 = sshll.u32 %s2436_s1, 4  ;;  %s1818_s21 = smov [#allocation6]   ;;  %s32_s20 = int_to_ptr.hbm [resolvable:$true] %s31_s20 }
   0x4   :  { %s33_s22 = sshll.u32 %s1818_s21, 4  ;;  %s18_s25 = sshll.u32 %s2435_s0, 4  ;;  %s34_s22 = int_to_ptr.vmem [resolvable:$true] %s33_s22  ;;  %s19_s25 = int_to_ptr.hbm [resolvable:$true] %s18_s25 }
   0x5   :  { %s1819_s26 = smov 128   ;;  %s1820_s27 = smov 8  }
   0x6   :  { %39 = dma.hbm_to_vmem [thread:$0]  %s32_s20, 512, %s34_s22, [#allocation7], %s1819_s26, %s1819_s26, %s1820_s27  }
   0x7   :  { %s1821_s28 = smov [#allocation3]   ;;  %s44_s7 = sshll.u32 %s2437_s2, 4  ;;  %s45_s7 = int_to_ptr.hbm [resolvable:$true] %s44_s7 }
   0x8   :  { %s20_s29 = sshll.u32 %s1821_s28, 4  ;;  %s59_s9 = sshll.u32 %s2439_s4, 4  ;;  %s21_s29 = int_to_ptr.vmem [resolvable:$true] %s20_s29  ;;  %s60_s9 = int_to_ptr.hbm [resolvable:$true] %s59_s9 }
   0x9   :  { %26 = dma.hbm_to_vmem [thread:$0]  %s19_s25, 512, %s21_s29, [#allocation4], %s1819_s26, %s1819_s26, %s1820_s27  }
   0xa   :  { %s1822_s10 = smov [#allocation8]   ;;  %s1823_s0 = smov [#allocation9]  }
   0xb   :  { %s46_s11 = sshll.u32 %s1822_s10, 4  ;;  %s61_s12 = sshll.u32 %s1823_s0, 4  ;;  %s47_s11 = int_to_ptr.vmem [resolvable:$true] %s46_s11  ;;  %s62_s12 = int_to_ptr.vmem [resolvable:$true] %s61_s12 }
   0xc   :  { %52 = dma.hbm_to_vmem [thread:$0]  %s45_s7, 512, %s47_s11, [#allocation7], %s1819_s26, %s1819_s26, %s1820_s27  }
   0xd   :  { %s1824_s13 = smov 256   ;;  %s1825_s14 = smov 16  }
   0xe   :  { %67 = dma.hbm_to_vmem [thread:$0]  %s60_s9, 8192, %s62_s12, [#allocation10], %s1824_s13, %s1824_s13, %s1825_s14  }
   0xf   :  { %1810 = dma.done.wait [#allocation4], 512  }
  0x10   :  { %1811 = vsyncadd [#allocation4], 4294966784 }
  0x11   :  { %1812 = dma.done.wait [#allocation7], 1024  }
  0x12   :  { %1813 = vsyncadd [#allocation7], 4294966272 }
  0x13   :  { %1814 = dma.done.wait [#allocation10], 8192  }
  0x14   :  { %1815 = vsyncadd [#allocation10], 4294959104  ;;  %v98_v0 = vld [vmem:[#allocation6 + $0x18] sm:$0xff]  ;;  %v97_v1 = vld [vmem:[#allocation6 + $0x10] sm:$0xff]  ;;  %vm103_vm0 = vcmask 261120   ;;  %v84_v8 = vlaneseq  ;;  %v1826_v11 = vmov 0.5  }
  0x15   :  { %128 = vmatpush.msra.mxu0 %v98_v0  ;;  %v96_v2 = vld [vmem:[#allocation6 + $0x8] sm:$0xff]  ;;  %v95_v3 = vld [vmem:[#allocation6] sm:$0xff]  ;;  %v93_v6 = vld [vmem:[#allocation3 + $0x10] sm:$0xff]  ;;  %s1828_s15 = smov 96   ;;  %s1829_s16 = smov 32   ;;  %vm386_vm4 = vcmask 523520  }
  0x16   :  { %v91_v4 = vld [vmem:[#allocation3] sm:$0xff]  ;;  %v92_v5 = vld [vmem:[#allocation3 + $0x8] sm:$0xff]  ;;  %v94_v7 = vld [vmem:[#allocation3 + $0x18] sm:$0xff]  ;;  %v85_v9 = vand.u32 127, %v84_v8  ;;  %vm536_vm5 = vcmask 785920   ;;  %vm670_vm6 = vcmask 1048320  }
  0x17   :  { %129 = vmatpush.msra.mxu0 %v97_v1  ;;  %v1545_v10 = vld [vmem:[%s2438_s3] ss:$0 sm:$0xff]  ;;  %s1827_s3 = smov 64   ;;  %v152_v54 = vld [vmem:[#allocation8 + $0x18] sm:$0xff]  ;;  %v151_v55 = vld [vmem:[#allocation8 + $0x10] sm:$0xff]  ;;  %s1830_s17 = smov [#allocation11]  }
  0x18   :  { %vm86_vm1 = vcmp.ge.s32.totalorder %v85_v9, 64  ;;  %vm87_vm2 = vcmp.lt.s32.totalorder %v85_v9, 96  ;;  %v150_v56 = vld [vmem:[#allocation8 + $0x8] sm:$0xff]  ;;  %v149_v59 = vld [vmem:[#allocation8] sm:$0xff]  ;;  %s1483_s18 = sshll.u32 %s1830_s17, 4  ;;  %s1485_s21 = sshll.u32 %s2440_s5, 4  ;;  %s1484_s18 = int_to_ptr.vmem [resolvable:$true] %s1483_s18  ;;  %s1486_s21 = int_to_ptr.hbm [resolvable:$true] %s1485_s21 }
  0x19   :  { %130 = vmatpush.msra.mxu0 %v96_v2  ;;  %vm88_vm3 = vmand %vm86_vm1, %vm87_vm2 }
  0x1a   :  { %v1883_v12 = vsel %vm88_vm3, 1.0, %v1826_v11  ;;  %v1892_v20 = vsel %vm88_vm3, 0.0, %v1826_v11 }
  0x1b   :  { %131 = vmatpush.msra.mxu0 %v95_v3  ;;  %v156_v57 = vmul.f32 %v152_v54, %v1883_v12  ;;  %v155_v58 = vmul.f32 %v151_v55, %v1883_v12  ;;  %v154_v60 = vmul.f32 %v150_v56, %v1883_v12  ;;  %v153_v61 = vmul.f32 %v149_v59, %v1883_v12 }
  0x1c   :  { %1500 = vmatmul.msk.f32.vlgmr.msra.gmra.mxu0 %vm103_vm0, %v91_v4 }
  0x1d   :  { %253 = vmatpush.msra.mxu1 %v156_v57  ;;  %419 = vmatpush.msra.mxu2 %v156_v57 }
  0x1e   :  { %569 = vmatpush.msra.mxu3 %v156_v57  ;;  %707 = vmatpush.msrb.mxu0 %v156_v57 }
  0x1f   :  { %254 = vmatpush.msra.mxu1 %v155_v58  ;;  %420 = vmatpush.msra.mxu2 %v155_v58 }
  0x20   :  { %570 = vmatpush.msra.mxu3 %v155_v58  ;;  %708 = vmatpush.msrb.mxu0 %v155_v58 }
  0x21   :  { %255 = vmatpush.msra.mxu1 %v154_v60  ;;  %421 = vmatpush.msra.mxu2 %v154_v60 }
  0x22   :  { %571 = vmatpush.msra.mxu3 %v154_v60  ;;  %709 = vmatpush.msrb.mxu0 %v154_v60 }
  0x23   :  { %256 = vmatpush.msra.mxu1 %v153_v61  ;;  %422 = vmatpush.msra.mxu2 %v153_v61 }
  0x24   :  { %1501 = vmatmul.msk.f32.gmra.mxu0 %vm103_vm0, %v92_v5  ;;  %572 = vmatpush.msra.mxu3 %v153_v61 }
  0x25   :  { %710 = vmatpush.msrb.mxu0 %v153_v61  ;;  %848 = vmatpush.msrb.mxu1 %v156_v57 }
  0x26   :  { %997 = vmatpush.msrb.mxu2 %v156_v57  ;;  %1146 = vmatpush.msrb.mxu3 %v156_v57 }
  0x27   :  { %849 = vmatpush.msrb.mxu1 %v155_v58 }
  0x28   :  { %998 = vmatpush.msrb.mxu2 %v155_v58  ;;  %1147 = vmatpush.msrb.mxu3 %v155_v58 }
  0x29   :  { %850 = vmatpush.msrb.mxu1 %v154_v60 }
  0x2a   :  { %999 = vmatpush.msrb.mxu2 %v154_v60  ;;  %1148 = vmatpush.msrb.mxu3 %v154_v60 }
  0x2b   :  { %851 = vmatpush.msrb.mxu1 %v153_v61 }
  0x2c   :  { %1502 = vmatmul.msk.f32.gmra.mxu0 %vm103_vm0, %v93_v6  ;;  %1000 = vmatpush.msrb.mxu2 %v153_v61 }
  0x2d   :  { %1149 = vmatpush.msrb.mxu3 %v153_v61 }
  0x34   :  { %1503 = vmatmul.msk.f32.gmra.mxu0 %vm103_vm0, %v94_v7 }
  0x99   :  { %v133_v13 = vpop.f32.mrf.mxu0 }
  0x9a   :  { %v134_v14 = vadd.f32 %v1545_v10, %v133_v13 }
  0x9c   :  { %v1886_v15 = vmul.f32 %v134_v14, %v1883_v12 }
  0x9e   :  { %1546 = vtanh.f32 %v1886_v15 }
  0xa1   :  { %v136_v16 = vpop.f32.mrf.mxu0 }
  0xa2   :  { %v137_v17 = vadd.f32 %v1545_v10, %v136_v16 }
  0xa4   :  { %v1547_v18 = vpop.eup %1546  ;;  %v1890_v19 = vmul.f32 %v137_v17, %v1883_v12 }
  0xa5   :  { %v161_v21 = vmul.f32 %v1547_v18, %v1883_v12 }
  0xa6   :  { %1548 = vtanh.f32 %v1890_v19 }
  0xa7   :  { %v165_v22 = vadd.f32 %v161_v21, %v1892_v20 }
  0xa9   :  { %v139_v23 = vpop.f32.mrf.mxu0  ;;  %173 = vrot.lane.b32.xlu0 %v165_v22, %s1827_s3 }
  0xaa   :  { %v140_v24 = vadd.f32 %v1545_v10, %v139_v23 }
  0xac   :  { %v1549_v25 = vpop.eup %1548  ;;  %v1899_v26 = vmul.f32 %v140_v24, %v1883_v12 }
  0xad   :  { %v162_v27 = vmul.f32 %v1549_v25, %v1883_v12 }
  0xae   :  { %1550 = vtanh.f32 %v1899_v26 }
  0xaf   :  { %v166_v28 = vadd.f32 %v162_v27, %v1892_v20 }
  0xb1   :  { %v142_v29 = vpop.f32.mrf.mxu0  ;;  %175 = vrot.lane.b32.xlu0 %v166_v28, %s1827_s3 }
  0xb2   :  { %v143_v30 = vadd.f32 %v1545_v10, %v142_v29 }
  0xb4   :  { %v1551_v31 = vpop.eup %1550  ;;  %v1906_v32 = vmul.f32 %v143_v30, %v1883_v12 }
  0xb5   :  { %v163_v33 = vmul.f32 %v1551_v31, %v1883_v12 }
  0xb6   :  { %1552 = vtanh.f32 %v1906_v32 }
  0xb7   :  { %v1911_v34 = vadd.f32 %v163_v33, %v1892_v20 }
  0xb9   :  { %177 = vrot.lane.b32.xlu1 %v1911_v34, %s1827_s3 }
  0xbc   :  { %v1553_v35 = vpop.eup %1552 }
  0xbd   :  { %v164_v36 = vmul.f32 %v1553_v35, %v1883_v12 }
  0xbf   :  { %v1917_v37 = vadd.f32 %v164_v36, %v1892_v20 }
  0xc1   :  { %179 = vrot.lane.b32.xlu1 %v1917_v37, %s1827_s3 }
 0x11b   :  { %v174_v38 = vpop.permute.xlu0 %173 }
 0x11c   :  { %v1921_v39 = vmul.f32 %v174_v38, %v165_v22 }
 0x11e   :  { %1554 = vtanh.f32 %v1921_v39 }
 0x123   :  { %v176_v40 = vpop.permute.xlu0 %175 }
 0x124   :  { %v1555_v41 = vpop.eup %1554  ;;  %v1924_v42 = vmul.f32 %v176_v40, %v166_v28 }
 0x125   :  { %197 = vrot.lane.b32.xlu2 %v1555_v41, %s1828_s15 }
 0x126   :  { %1556 = vtanh.f32 %v1924_v42 }
 0x12b   :  { %v178_v43 = vpop.permute.xlu1 %177 }
 0x12c   :  { %v1557_v44 = vpop.eup %1556  ;;  %v1929_v45 = vmul.f32 %v178_v43, %v1911_v34 }
 0x12d   :  { %199 = vrot.lane.b32.xlu2 %v1557_v44, %s1828_s15 }
 0x12e   :  { %1558 = vtanh.f32 %v1929_v45 }
 0x133   :  { %v180_v46 = vpop.permute.xlu1 %179 }
 0x134   :  { %v1559_v47 = vpop.eup %1558  ;;  %v1934_v48 = vmul.f32 %v180_v46, %v1917_v37 }
 0x135   :  { %201 = vrot.lane.b32.xlu0 %v1559_v47, %s1828_s15 }
 0x136   :  { %1560 = vtanh.f32 %v1934_v48 }
 0x13c   :  { %v1561_v49 = vpop.eup %1560 }
 0x13d   :  { %203 = vrot.lane.b32.xlu1 %v1561_v49, %s1828_s15 }
 0x17f   :  { %v198_v50 = vpop.permute.xlu2 %197 }
 0x180   :  { %v209_v51 = vmul.f32 %v198_v50, %v165_v22 }
 0x182   :  { %217 = vrot.lane.b32.xlu2 %v209_v51, %s1829_s16 }
 0x187   :  { %v200_v52 = vpop.permute.xlu2 %199 }
 0x188   :  { %v210_v53 = vmul.f32 %v200_v52, %v166_v28 }
 0x18a   :  { %219 = vrot.lane.b32.xlu0 %v210_v53, %s1829_s16 }
 0x1a7   :  { %v202_v62 = vpop.permute.xlu0 %201 }
 0x1a8   :  { %v211_v63 = vmul.f32 %v202_v62, %v1911_v34 }
 0x1aa   :  { %221 = vrot.lane.b32.xlu1 %v211_v63, %s1829_s16 }
 0x1af   :  { %v204_v0 = vpop.permute.xlu1 %203 }
 0x1b0   :  { %v212_v1 = vmul.f32 %v204_v0, %v1917_v37 }
 0x1b2   :  { %223 = vrot.lane.b32.xlu2 %v212_v1, %s1829_s16 }
 0x1dc   :  { %v218_v2 = vpop.permute.xlu2 %217 }
 0x1dd   :  { %229 = vst.msk [vmem:[#allocation2] sm:$0xff] %vm103_vm0, %v218_v2  ;;  %1504 = vmatmul.msk.f32.vlgmr.msra.gmra.mxu1 %vm103_vm0, %v218_v2 }
 0x1fc   :  { %v220_v3 = vpop.permute.xlu0 %219 }
 0x1fd   :  { %230 = vst.msk [vmem:[#allocation2 + $0x10] sm:$0xff] %vm103_vm0, %v220_v3  ;;  %1505 = vmatmul.msk.f32.gmra.mxu1 %vm103_vm0, %v220_v3 }
 0x20c   :  { %v224_v4 = vpop.permute.xlu2 %223 }
 0x20d   :  { %232 = vst.msk [vmem:[#allocation2 + $0x30] sm:$0xff] %vm103_vm0, %v224_v4 }
 0x21c   :  { %v222_v5 = vpop.permute.xlu1 %221 }
 0x21d   :  { %231 = vst.msk [vmem:[#allocation2 + $0x20] sm:$0xff] %vm103_vm0, %v222_v5  ;;  %1506 = vmatmul.msk.f32.gmra.mxu1 %vm103_vm0, %v222_v5 }
 0x225   :  { %1507 = vmatmul.msk.f32.gmra.mxu1 %vm103_vm0, %v224_v4 }
 0x25a   :  { %v258_v6 = vpop.f32.mrf.mxu1 }
 0x25b   :  { %v270_v7 = vadd.f32 %v258_v6, %v1886_v15 }
 0x25d   :  { %1562 = vtanh.f32 %v270_v7 }
 0x263   :  { %v1563_v8 = vpop.eup %1562 }
 0x264   :  { %v278_v9 = vmul.f32 %v1563_v8, %v1883_v12 }
 0x266   :  { %v1960_v10 = vadd.f32 %v278_v9, %v1892_v20 }
 0x268   :  { %310 = vrot.lane.b32.xlu0 %v1960_v10, %s1827_s3 }
 0x27a   :  { %v261_v11 = vpop.f32.mrf.mxu1 }
 0x27b   :  { %v271_v13 = vadd.f32 %v261_v11, %v1890_v19 }
 0x27d   :  { %1564 = vtanh.f32 %v271_v13 }
 0x283   :  { %v1565_v14 = vpop.eup %1564 }
 0x284   :  { %v279_v16 = vmul.f32 %v1565_v14, %v1883_v12 }
 0x286   :  { %v1967_v17 = vadd.f32 %v279_v16, %v1892_v20 }
 0x288   :  { %312 = vrot.lane.b32.xlu1 %v1967_v17, %s1827_s3 }
 0x290   :  { %290 = vrot.lane.b32.xlu1 %v1921_v39, %s1829_s16 }
 0x29a   :  { %v264_v18 = vpop.f32.mrf.mxu1 }
 0x29b   :  { %v272_v21 = vadd.f32 %v264_v18, %v1899_v26 }
 0x29d   :  { %1566 = vtanh.f32 %v272_v21 }
 0x2a2   :  { %v267_v22 = vpop.f32.mrf.mxu1 }
 0x2a3   :  { %v1567_v23 = vpop.eup %1566  ;;  %v273_v24 = vadd.f32 %v267_v22, %v1906_v32 }
 0x2a4   :  { %v280_v25 = vmul.f32 %v1567_v23, %v1883_v12 }
 0x2a5   :  { %1568 = vtanh.f32 %v273_v24 }
 0x2a6   :  { %v284_v27 = vadd.f32 %v280_v25, %v1892_v20 }
 0x2a8   :  { %314 = vrot.lane.b32.xlu2 %v284_v27, %s1827_s3 }
 0x2ab   :  { %v1569_v28 = vpop.eup %1568 }
 0x2ac   :  { %v281_v29 = vmul.f32 %v1569_v28, %v1883_v12 }
 0x2ae   :  { %v285_v30 = vadd.f32 %v281_v29, %v1892_v20 }
 0x2b0   :  { %316 = vrot.lane.b32.xlu0 %v285_v30, %s1827_s3 }
 0x2b8   :  { %292 = vrot.lane.b32.xlu0 %v1924_v42, %s1829_s16 }
 0x2da   :  { %v311_v31 = vpop.permute.xlu0 %310 }
 0x2db   :  { %v322_v33 = vmul.f32 %v311_v31, %v1960_v10 }
 0x2dd   :  { %330 = vrot.lane.b32.xlu2 %v322_v33, %s1829_s16 }
 0x2e5   :  { %294 = vrot.lane.b32.xlu2 %v1929_v45, %s1829_s16 }
 0x2fa   :  { %v313_v34 = vpop.permute.xlu1 %312 }
 0x2fb   :  { %v323_v35 = vmul.f32 %v313_v34, %v1967_v17 }
 0x2fd   :  { %332 = vrot.lane.b32.xlu1 %v323_v35, %s1829_s16 }
 0x302   :  { %v315_v36 = vpop.permute.xlu2 %314  ;;  %v291_v40 = vpop.permute.xlu1 %290 }
 0x303   :  { %v324_v37 = vmul.f32 %v315_v36, %v284_v27  ;;  %v302_v41 = vmul.f32 %v291_v40, %v1960_v10 }
 0x305   :  { %296 = vrot.lane.b32.xlu1 %v1934_v48, %s1829_s16  ;;  %334 = vrot.lane.b32.xlu0 %v324_v37, %s1829_s16 }
 0x322   :  { %v317_v38 = vpop.permute.xlu0 %316 }
 0x323   :  { %v325_v39 = vmul.f32 %v317_v38, %v285_v30 }
 0x325   :  { %336 = vrot.lane.b32.xlu2 %v325_v39, %s1829_s16 }
 0x32a   :  { %v293_v45 = vpop.permute.xlu0 %292 }
 0x32b   :  { %v303_v46 = vmul.f32 %v293_v45, %v1967_v17 }
 0x337   :  { %v331_v42 = vpop.permute.xlu2 %330 }
 0x338   :  { %v1994_v43 = vadd.f32 %v331_v42, %v302_v41 }
 0x33a   :  { %1570 = vtanh.f32 %v1994_v43 }
 0x33f   :  { %v295_v49 = vpop.permute.xlu2 %294 }
 0x340   :  { %v1571_v44 = vpop.eup %1570  ;;  %v304_v50 = vmul.f32 %v295_v49, %v284_v27 }
 0x341   :  { %354 = vrot.lane.b32.xlu0 %v1571_v44, %s1827_s3 }
 0x36f   :  { %v333_v47 = vpop.permute.xlu1 %332 }
 0x370   :  { %v1999_v48 = vadd.f32 %v333_v47, %v303_v46 }
 0x372   :  { %1572 = vtanh.f32 %v1999_v48 }
 0x377   :  { %v335_v51 = vpop.permute.xlu0 %334  ;;  %v297_v54 = vpop.permute.xlu1 %296 }
 0x378   :  { %v1573_v52 = vpop.eup %1572  ;;  %v2002_v53 = vadd.f32 %v335_v51, %v304_v50  ;;  %v305_v55 = vmul.f32 %v297_v54, %v285_v30 }
 0x379   :  { %356 = vrot.lane.b32.xlu1 %v1573_v52, %s1827_s3 }
 0x37a   :  { %1574 = vtanh.f32 %v2002_v53 }
 0x37f   :  { %v337_v56 = vpop.permute.xlu2 %336 }
 0x380   :  { %v1575_v57 = vpop.eup %1574  ;;  %v2006_v58 = vadd.f32 %v337_v56, %v305_v55 }
 0x381   :  { %358 = vrot.lane.b32.xlu2 %v1575_v57, %s1827_s3 }
 0x382   :  { %1576 = vtanh.f32 %v2006_v58 }
 0x388   :  { %v1577_v59 = vpop.eup %1576 }
 0x389   :  { %360 = vrot.lane.b32.xlu0 %v1577_v59, %s1827_s3 }
 0x3b3   :  { %v355_v60 = vpop.permute.xlu0 %354 }
 0x3b4   :  { %v2012_v61 = vmul.f32 %v355_v60, %v1960_v10 }
 0x3b6   :  { %391 = vrot.lane.b32.xlu1 %v2012_v61, %s1829_s16 }
 0x3db   :  { %v359_v62 = vpop.permute.xlu2 %358 }
 0x3dc   :  { %v2016_v63 = vmul.f32 %v359_v62, %v284_v27 }
 0x3de   :  { %395 = vrot.lane.b32.xlu0 %v2016_v63, %s1829_s16 }
 0x3eb   :  { %v357_v0 = vpop.permute.xlu1 %356 }
 0x3ec   :  { %v2021_v1 = vmul.f32 %v357_v0, %v1967_v17 }
 0x3ee   :  { %393 = vrot.lane.b32.xlu2 %v2021_v1, %s1829_s16 }
 0x3fb   :  { %v361_v2 = vpop.permute.xlu0 %360 }
 0x3fc   :  { %v2025_v3 = vmul.f32 %v361_v2, %v285_v30 }
 0x3fe   :  { %397 = vrot.lane.b32.xlu1 %v2025_v3, %s1829_s16 }
 0x428   :  { %v392_v4 = vpop.permute.xlu1 %391 }
 0x429   :  { %1508 = vmatmul.msk.f32.vlgmr.msra.gmra.mxu2 %vm103_vm0, %v392_v4 }
 0x448   :  { %v394_v5 = vpop.permute.xlu2 %393 }
 0x449   :  { %1509 = vmatmul.msk.f32.gmra.mxu2 %vm103_vm0, %v394_v5 }
 0x450   :  { %v396_v6 = vpop.permute.xlu0 %395 }
 0x451   :  { %1510 = vmatmul.msk.f32.gmra.mxu2 %vm103_vm0, %v396_v6 }
 0x470   :  { %v398_v7 = vpop.permute.xlu1 %397 }
 0x471   :  { %1511 = vmatmul.msk.f32.gmra.mxu2 %vm103_vm0, %v398_v7 }
 0x4ac   :  { %v424_v8 = vpop.f32.mrf.mxu2 }
 0x4ad   :  { %v436_v9 = vadd.f32 %v424_v8, %v1886_v15 }
 0x4af   :  { %1578 = vtanh.f32 %v436_v9 }
 0x4b5   :  { %v1579_v10 = vpop.eup %1578 }
 0x4b6   :  { %v444_v11 = vmul.f32 %v1579_v10, %v1883_v12 }
 0x4b8   :  { %v448_v13 = vadd.f32 %v444_v11, %v1892_v20 }
 0x4ba   :  { %460 = vrot.lane.b32.xlu2 %v448_v13, %s1827_s3  ;;  %v452_v42 = vmul.f32 %v448_v13, %v1994_v43 }
 0x4cc   :  { %v427_v14 = vpop.f32.mrf.mxu2 }
 0x4cd   :  { %v437_v16 = vadd.f32 %v427_v14, %v1890_v19 }
 0x4cf   :  { %1580 = vtanh.f32 %v437_v16 }
 0x4d4   :  { %v430_v17 = vpop.f32.mrf.mxu2 }
 0x4d5   :  { %v1581_v18 = vpop.eup %1580  ;;  %v438_v21 = vadd.f32 %v430_v17, %v1899_v26 }
 0x4d6   :  { %v445_v22 = vmul.f32 %v1581_v18, %v1883_v12 }
 0x4d7   :  { %1582 = vtanh.f32 %v438_v21 }
 0x4d8   :  { %v449_v23 = vadd.f32 %v445_v22, %v1892_v20 }
 0x4da   :  { %462 = vrot.lane.b32.xlu0 %v449_v23, %s1827_s3  ;;  %v453_v43 = vmul.f32 %v449_v23, %v1999_v48 }
 0x4dd   :  { %v1583_v24 = vpop.eup %1582 }
 0x4de   :  { %v446_v25 = vmul.f32 %v1583_v24, %v1883_v12 }
 0x4e0   :  { %v450_v27 = vadd.f32 %v446_v25, %v1892_v20 }
 0x4e2   :  { %464 = vrot.lane.b32.xlu1 %v450_v27, %s1827_s3  ;;  %v454_v47 = vmul.f32 %v450_v27, %v2002_v53 }
 0x4f4   :  { %v433_v28 = vpop.f32.mrf.mxu2 }
 0x4f5   :  { %v439_v29 = vadd.f32 %v433_v28, %v1906_v32 }
 0x4f7   :  { %1584 = vtanh.f32 %v439_v29 }
 0x4fd   :  { %v1585_v30 = vpop.eup %1584 }
 0x4fe   :  { %v447_v31 = vmul.f32 %v1585_v30, %v1883_v12 }
 0x500   :  { %v451_v33 = vadd.f32 %v447_v31, %v1892_v20 }
 0x502   :  { %466 = vrot.lane.b32.xlu2 %v451_v33, %s1827_s3  ;;  %v455_v53 = vmul.f32 %v451_v33, %v2006_v58 }
 0x514   :  { %v461_v34 = vpop.permute.xlu2 %460 }
 0x515   :  { %v472_v35 = vmul.f32 %v461_v34, %v448_v13 }
 0x517   :  { %480 = vrot.lane.b32.xlu0 %v472_v35, %s1829_s16 }
 0x54c   :  { %v463_v36 = vpop.permute.xlu0 %462 }
 0x54d   :  { %v473_v37 = vmul.f32 %v463_v36, %v449_v23 }
 0x54f   :  { %482 = vrot.lane.b32.xlu1 %v473_v37, %s1829_s16 }
 0x554   :  { %v465_v38 = vpop.permute.xlu1 %464 }
 0x555   :  { %v474_v39 = vmul.f32 %v465_v38, %v450_v27 }
 0x557   :  { %484 = vrot.lane.b32.xlu2 %v474_v39, %s1829_s16 }
 0x55c   :  { %v467_v40 = vpop.permute.xlu2 %466 }
 0x55d   :  { %v475_v41 = vmul.f32 %v467_v40, %v451_v33 }
 0x55f   :  { %486 = vrot.lane.b32.xlu0 %v475_v41, %s1829_s16 }
 0x589   :  { %v481_v44 = vpop.permute.xlu0 %480 }
 0x58a   :  { %v2054_v45 = vadd.f32 %v481_v44, %v452_v42 }
 0x58c   :  { %1586 = vtanh.f32 %v2054_v45 }
 0x592   :  { %v1587_v46 = vpop.eup %1586 }
 0x593   :  { %504 = vrot.lane.b32.xlu1 %v1587_v46, %s1827_s3 }
 0x5b1   :  { %v485_v49 = vpop.permute.xlu2 %484 }
 0x5b2   :  { %v2059_v50 = vadd.f32 %v485_v49, %v454_v47 }
 0x5b4   :  { %1588 = vtanh.f32 %v2059_v50 }
 0x5ba   :  { %v1589_v51 = vpop.eup %1588 }
 0x5bb   :  { %508 = vrot.lane.b32.xlu0 %v1589_v51, %s1827_s3 }
 0x5c1   :  { %v483_v52 = vpop.permute.xlu1 %482 }
 0x5c2   :  { %v2064_v54 = vadd.f32 %v483_v52, %v453_v43 }
 0x5c4   :  { %1590 = vtanh.f32 %v2064_v54 }
 0x5ca   :  { %v1591_v55 = vpop.eup %1590 }
 0x5cb   :  { %506 = vrot.lane.b32.xlu2 %v1591_v55, %s1827_s3 }
 0x5d1   :  { %v487_v56 = vpop.permute.xlu0 %486 }
 0x5d2   :  { %v2069_v57 = vadd.f32 %v487_v56, %v455_v53 }
 0x5d4   :  { %1592 = vtanh.f32 %v2069_v57 }
 0x5da   :  { %v1593_v59 = vpop.eup %1592 }
 0x5db   :  { %510 = vrot.lane.b32.xlu1 %v1593_v59, %s1827_s3 }
 0x605   :  { %v505_v60 = vpop.permute.xlu1 %504 }
 0x606   :  { %v2073_v48 = vmul.f32 %v505_v60, %v448_v13 }
 0x608   :  { %541 = vrot.lane.b32.xlu2 %v2073_v48, %s1829_s16 }
 0x625   :  { %v507_v62 = vpop.permute.xlu2 %506 }
 0x626   :  { %v2077_v0 = vmul.f32 %v507_v62, %v449_v23 }
 0x628   :  { %543 = vrot.lane.b32.xlu0 %v2077_v0, %s1829_s16 }
 0x62d   :  { %v509_v58 = vpop.permute.xlu0 %508 }
 0x62e   :  { %v2081_v2 = vmul.f32 %v509_v58, %v450_v27 }
 0x630   :  { %545 = vrot.lane.b32.xlu1 %v2081_v2, %s1829_s16 }
 0x64d   :  { %v511_v4 = vpop.permute.xlu1 %510 }
 0x64e   :  { %v2085_v5 = vmul.f32 %v511_v4, %v451_v33 }
 0x650   :  { %547 = vrot.lane.b32.xlu2 %v2085_v5, %s1829_s16 }
 0x662   :  { %v542_v6 = vpop.permute.xlu2 %541 }
 0x663   :  { %1512 = vmatmul.msk.f32.vlgmr.msra.gmra.mxu3 %vm103_vm0, %v542_v6 }
 0x69a   :  { %v544_v7 = vpop.permute.xlu0 %543 }
 0x69b   :  { %1513 = vmatmul.msk.f32.gmra.mxu3 %vm103_vm0, %v544_v7 }
 0x6a2   :  { %v546_v8 = vpop.permute.xlu1 %545 }
 0x6a3   :  { %1514 = vmatmul.msk.f32.gmra.mxu3 %vm103_vm0, %v546_v8 }
 0x6aa   :  { %v548_v9 = vpop.permute.xlu2 %547 }
 0x6ab   :  { %1515 = vmatmul.msk.f32.gmra.mxu3 %vm103_vm0, %v548_v9 }
 0x6e6   :  { %v574_v10 = vpop.f32.mrf.mxu3 }
 0x6e7   :  { %v586_v11 = vadd.f32 %v574_v10, %v1886_v15 }
 0x6e9   :  { %1594 = vtanh.f32 %v586_v11 }
 0x6ef   :  { %v1595_v13 = vpop.eup %1594 }
 0x6f0   :  { %v594_v14 = vmul.f32 %v1595_v13, %v1883_v12 }
 0x6f2   :  { %v598_v16 = vadd.f32 %v594_v14, %v1892_v20 }
 0x6f4   :  { %610 = vrot.lane.b32.xlu0 %v598_v16, %s1827_s3  ;;  %v602_v46 = vmul.f32 %v598_v16, %v2054_v45 }
 0x71e   :  { %v577_v17 = vpop.f32.mrf.mxu3 }
 0x71f   :  { %v587_v18 = vadd.f32 %v577_v17, %v1890_v19 }
 0x721   :  { %1596 = vtanh.f32 %v587_v18 }
 0x726   :  { %v580_v21 = vpop.f32.mrf.mxu3 }
 0x727   :  { %v1597_v22 = vpop.eup %1596  ;;  %v588_v23 = vadd.f32 %v580_v21, %v1899_v26 }
 0x728   :  { %v595_v24 = vmul.f32 %v1597_v22, %v1883_v12 }
 0x729   :  { %1598 = vtanh.f32 %v588_v23 }
 0x72a   :  { %v599_v25 = vadd.f32 %v595_v24, %v1892_v20 }
 0x72c   :  { %612 = vrot.lane.b32.xlu1 %v599_v25, %s1827_s3  ;;  %v603_v43 = vmul.f32 %v599_v25, %v2064_v54 }
 0x72e   :  { %v583_v27 = vpop.f32.mrf.mxu3 }
 0x72f   :  { %v1599_v28 = vpop.eup %1598  ;;  %v589_v29 = vadd.f32 %v583_v27, %v1906_v32 }
 0x730   :  { %v596_v30 = vmul.f32 %v1599_v28, %v1883_v12 }
 0x731   :  { %1600 = vtanh.f32 %v589_v29 }
 0x732   :  { %v600_v31 = vadd.f32 %v596_v30, %v1892_v20 }
 0x734   :  { %614 = vrot.lane.b32.xlu2 %v600_v31, %s1827_s3  ;;  %v604_v53 = vmul.f32 %v600_v31, %v2059_v50 }
 0x737   :  { %v1601_v33 = vpop.eup %1600 }
 0x738   :  { %v597_v34 = vmul.f32 %v1601_v33, %v1883_v12 }
 0x73a   :  { %v601_v35 = vadd.f32 %v597_v34, %v1892_v20 }
 0x73c   :  { %616 = vrot.lane.b32.xlu0 %v601_v35, %s1827_s3  ;;  %v605_v54 = vmul.f32 %v601_v35, %v2069_v57 }
 0x766   :  { %v611_v36 = vpop.permute.xlu0 %610 }
 0x767   :  { %v622_v37 = vmul.f32 %v611_v36, %v598_v16 }
 0x769   :  { %630 = vrot.lane.b32.xlu1 %v622_v37, %s1829_s16 }
 0x78e   :  { %v615_v38 = vpop.permute.xlu2 %614 }
 0x78f   :  { %v624_v39 = vmul.f32 %v615_v38, %v600_v31 }
 0x791   :  { %634 = vrot.lane.b32.xlu0 %v624_v39, %s1829_s16 }
 0x79e   :  { %v613_v40 = vpop.permute.xlu1 %612 }
 0x79f   :  { %v623_v41 = vmul.f32 %v613_v40, %v599_v25 }
 0x7a1   :  { %632 = vrot.lane.b32.xlu2 %v623_v41, %s1829_s16 }
 0x7ae   :  { %v617_v42 = vpop.permute.xlu0 %616 }
 0x7af   :  { %v625_v44 = vmul.f32 %v617_v42, %v601_v35 }
 0x7b1   :  { %636 = vrot.lane.b32.xlu1 %v625_v44, %s1829_s16 }
 0x7db   :  { %v631_v47 = vpop.permute.xlu1 %630 }
 0x7dc   :  { %v2114_v49 = vadd.f32 %v631_v47, %v602_v46 }
 0x7de   :  { %1602 = vtanh.f32 %v2114_v49 }
 0x7e4   :  { %v1603_v51 = vpop.eup %1602 }
 0x7e5   :  { %654 = vrot.lane.b32.xlu2 %v1603_v51, %s1827_s3 }
 0x7fb   :  { %v633_v52 = vpop.permute.xlu2 %632 }
 0x7fc   :  { %v2119_v55 = vadd.f32 %v633_v52, %v603_v43 }
 0x7fe   :  { %1604 = vtanh.f32 %v2119_v55 }
 0x803   :  { %v635_v56 = vpop.permute.xlu0 %634 }
 0x804   :  { %v1605_v59 = vpop.eup %1604  ;;  %v2123_v45 = vadd.f32 %v635_v56, %v604_v53 }
 0x805   :  { %656 = vrot.lane.b32.xlu0 %v1605_v59, %s1827_s3 }
 0x806   :  { %1606 = vtanh.f32 %v2123_v45 }
 0x80c   :  { %v1607_v60 = vpop.eup %1606 }
 0x80d   :  { %658 = vrot.lane.b32.xlu1 %v1607_v60, %s1827_s3 }
 0x823   :  { %v637_v62 = vpop.permute.xlu1 %636 }
 0x824   :  { %v2129_v58 = vadd.f32 %v637_v62, %v605_v54 }
 0x826   :  { %1608 = vtanh.f32 %v2129_v58 }
 0x82c   :  { %v1609_v4 = vpop.eup %1608 }
 0x82d   :  { %660 = vrot.lane.b32.xlu2 %v1609_v4, %s1827_s3 }
 0x83f   :  { %v655_v50 = vpop.permute.xlu2 %654 }
 0x840   :  { %v2133_v6 = vmul.f32 %v655_v50, %v598_v16 }
 0x842   :  { %679 = vrot.lane.b32.xlu0 %v2133_v6, %s1829_s16 }
 0x877   :  { %v657_v7 = vpop.permute.xlu0 %656 }
 0x878   :  { %v2137_v8 = vmul.f32 %v657_v7, %v599_v25 }
 0x87a   :  { %681 = vrot.lane.b32.xlu1 %v2137_v8, %s1829_s16 }
 0x87f   :  { %v659_v57 = vpop.permute.xlu1 %658 }
 0x880   :  { %v2141_v9 = vmul.f32 %v659_v57, %v600_v31 }
 0x882   :  { %683 = vrot.lane.b32.xlu2 %v2141_v9, %s1829_s16 }
 0x887   :  { %v661_v10 = vpop.permute.xlu2 %660 }
 0x888   :  { %v2145_v11 = vmul.f32 %v661_v10, %v601_v35 }
 0x88a   :  { %685 = vrot.lane.b32.xlu0 %v2145_v11, %s1829_s16 }
 0x8b4   :  { %v680_v13 = vpop.permute.xlu0 %679 }
 0x8b5   :  { %1516 = vmatmul.msk.f32.vlgmr.msrb.gmra.mxu0 %vm103_vm0, %v680_v13 }
 0x8dc   :  { %v684_v16 = vpop.permute.xlu2 %683 }
 0x8ec   :  { %v682_v14 = vpop.permute.xlu1 %681 }
 0x8ed   :  { %1517 = vmatmul.msk.f32.gmra.mxu0 %vm103_vm0, %v682_v14 }
 0x8f5   :  { %1518 = vmatmul.msk.f32.gmra.mxu0 %vm103_vm0, %v684_v16 }
 0x8fc   :  { %v686_v17 = vpop.permute.xlu0 %685 }
 0x8fd   :  { %1519 = vmatmul.msk.f32.gmra.mxu0 %vm103_vm0, %v686_v17 }
 0x932   :  { %v712_v18 = vpop.f32.mrf.mxu0 }
 0x933   :  { %v724_v21 = vadd.f32 %v712_v18, %v1886_v15 }
 0x935   :  { %1610 = vtanh.f32 %v724_v21 }
 0x93b   :  { %v1611_v22 = vpop.eup %1610 }
 0x93c   :  { %v732_v23 = vmul.f32 %v1611_v22, %v1883_v12 }
 0x93e   :  { %v736_v24 = vadd.f32 %v732_v23, %v1892_v20 }
 0x940   :  { %748 = vrot.lane.b32.xlu1 %v736_v24, %s1827_s3  ;;  %v740_v56 = vmul.f32 %v736_v24, %v2114_v49 }
 0x96a   :  { %v715_v25 = vpop.f32.mrf.mxu0 }
 0x96b   :  { %v725_v27 = vadd.f32 %v715_v25, %v1890_v19 }
 0x96d   :  { %1612 = vtanh.f32 %v725_v27 }
 0x972   :  { %v718_v28 = vpop.f32.mrf.mxu0 }
 0x973   :  { %v1613_v29 = vpop.eup %1612  ;;  %v726_v30 = vadd.f32 %v718_v28, %v1899_v26 }
 0x974   :  { %v733_v31 = vmul.f32 %v1613_v29, %v1883_v12 }
 0x975   :  { %1614 = vtanh.f32 %v726_v30 }
 0x976   :  { %v737_v33 = vadd.f32 %v733_v31, %v1892_v20 }
 0x978   :  { %750 = vrot.lane.b32.xlu2 %v737_v33, %s1827_s3  ;;  %v741_v62 = vmul.f32 %v737_v33, %v2119_v55 }
 0x97a   :  { %v721_v34 = vpop.f32.mrf.mxu0 }
 0x97b   :  { %v1615_v35 = vpop.eup %1614  ;;  %v727_v36 = vadd.f32 %v721_v34, %v1906_v32 }
 0x97c   :  { %v734_v37 = vmul.f32 %v1615_v35, %v1883_v12 }
 0x97d   :  { %1616 = vtanh.f32 %v727_v36 }
 0x97e   :  { %v738_v38 = vadd.f32 %v734_v37, %v1892_v20 }
 0x980   :  { %752 = vrot.lane.b32.xlu0 %v738_v38, %s1827_s3  ;;  %v742_v55 = vmul.f32 %v738_v38, %v2123_v45 }
 0x983   :  { %v1617_v39 = vpop.eup %1616 }
 0x984   :  { %v735_v40 = vmul.f32 %v1617_v39, %v1883_v12 }
 0x986   :  { %v739_v41 = vadd.f32 %v735_v40, %v1892_v20 }
 0x988   :  { %754 = vrot.lane.b32.xlu1 %v739_v41, %s1827_s3  ;;  %v743_v49 = vmul.f32 %v739_v41, %v2129_v58 }
 0x9b2   :  { %v749_v42 = vpop.permute.xlu1 %748 }
 0x9b3   :  { %v760_v44 = vmul.f32 %v749_v42, %v736_v24 }
 0x9b5   :  { %768 = vrot.lane.b32.xlu2 %v760_v44, %s1829_s16 }
 0x9d2   :  { %v751_v46 = vpop.permute.xlu2 %750 }
 0x9d3   :  { %v761_v47 = vmul.f32 %v751_v46, %v737_v33 }
 0x9d5   :  { %770 = vrot.lane.b32.xlu0 %v761_v47, %s1829_s16 }
 0x9f2   :  { %v753_v51 = vpop.permute.xlu0 %752 }
 0x9f3   :  { %v762_v43 = vmul.f32 %v753_v51, %v738_v38 }
 0x9f5   :  { %772 = vrot.lane.b32.xlu1 %v762_v43, %s1829_s16 }
 0x9fa   :  { %v755_v52 = vpop.permute.xlu1 %754 }
 0x9fb   :  { %v763_v53 = vmul.f32 %v755_v52, %v739_v41 }
 0x9fd   :  { %774 = vrot.lane.b32.xlu2 %v763_v53, %s1829_s16 }
 0xa0f   :  { %v769_v59 = vpop.permute.xlu2 %768 }
 0xa10   :  { %v2174_v60 = vadd.f32 %v769_v59, %v740_v56 }
 0xa12   :  { %1618 = vtanh.f32 %v2174_v60 }
 0xa18   :  { %v1619_v54 = vpop.eup %1618 }
 0xa19   :  { %792 = vrot.lane.b32.xlu0 %v1619_v54, %s1827_s3 }
 0xa47   :  { %v771_v4 = vpop.permute.xlu0 %770 }
 0xa48   :  { %v2179_v50 = vadd.f32 %v771_v4, %v741_v62 }
 0xa4a   :  { %1620 = vtanh.f32 %v2179_v50 }
 0xa50   :  { %v1621_v7 = vpop.eup %1620 }
 0xa51   :  { %794 = vrot.lane.b32.xlu1 %v1621_v7, %s1827_s3 }
 0xa57   :  { %v775_v57 = vpop.permute.xlu2 %774 }
 0xa58   :  { %v2184_v10 = vadd.f32 %v775_v57, %v743_v49 }
 0xa5a   :  { %1622 = vtanh.f32 %v2184_v10 }
 0xa60   :  { %v1623_v13 = vpop.eup %1622 }
 0xa61   :  { %798 = vrot.lane.b32.xlu0 %v1623_v13, %s1827_s3 }
 0xa67   :  { %v773_v14 = vpop.permute.xlu1 %772 }
 0xa68   :  { %v2189_v16 = vadd.f32 %v773_v14, %v742_v55 }
 0xa6a   :  { %1624 = vtanh.f32 %v2189_v16 }
 0xa70   :  { %v1625_v17 = vpop.eup %1624 }
 0xa71   :  { %796 = vrot.lane.b32.xlu2 %v1625_v17, %s1827_s3 }
 0xa8b   :  { %v793_v18 = vpop.permute.xlu0 %792 }
 0xa8c   :  { %v804_v58 = vmul.f32 %v793_v18, %v736_v24 }
 0xa8e   :  { %812 = vrot.lane.b32.xlu1 %v804_v58, %s1829_s16 }
 0xac3   :  { %v795_v21 = vpop.permute.xlu1 %794 }
 0xac4   :  { %v805_v22 = vmul.f32 %v795_v21, %v737_v33 }
 0xac6   :  { %814 = vrot.lane.b32.xlu2 %v805_v22, %s1829_s16 }
 0xacb   :  { %v797_v23 = vpop.permute.xlu2 %796 }
 0xacc   :  { %v806_v25 = vmul.f32 %v797_v23, %v738_v38 }
 0xace   :  { %816 = vrot.lane.b32.xlu0 %v806_v25, %s1829_s16 }
 0xad3   :  { %v799_v45 = vpop.permute.xlu0 %798 }
 0xad4   :  { %v807_v27 = vmul.f32 %v799_v45, %v739_v41 }
 0xad6   :  { %818 = vrot.lane.b32.xlu1 %v807_v27, %s1829_s16 }
 0xb00   :  { %v813_v28 = vpop.permute.xlu1 %812 }
 0xb01   :  { %824 = vst.msk [vmem:[#allocation2 + $0x8] sm:$0xff] %vm103_vm0, %v813_v28  ;;  %1520 = vmatmul.msk.f32.vlgmr.msrb.gmra.mxu1 %vm103_vm0, %v813_v28 }
 0xb20   :  { %v815_v24 = vpop.permute.xlu2 %814 }
 0xb21   :  { %825 = vst.msk [vmem:[#allocation2 + $0x18] sm:$0xff] %vm103_vm0, %v815_v24  ;;  %1521 = vmatmul.msk.f32.gmra.mxu1 %vm103_vm0, %v815_v24 }
 0xb40   :  { %v817_v29 = vpop.permute.xlu0 %816 }
 0xb41   :  { %826 = vst.msk [vmem:[#allocation2 + $0x28] sm:$0xff] %vm103_vm0, %v817_v29  ;;  %1522 = vmatmul.msk.f32.gmra.mxu1 %vm103_vm0, %v817_v29 }
 0xb48   :  { %v819_v30 = vpop.permute.xlu1 %818 }
 0xb49   :  { %827 = vst.msk [vmem:[#allocation2 + $0x38] sm:$0xff] %vm103_vm0, %v819_v30  ;;  %1523 = vmatmul.msk.f32.gmra.mxu1 %vm103_vm0, %v819_v30 }
 0xb7e   :  { %v853_v31 = vpop.f32.mrf.mxu1 }
 0xb7f   :  { %v865_v33 = vadd.f32 %v853_v31, %v1886_v15 }
 0xb81   :  { %1626 = vtanh.f32 %v865_v33 }
 0xb87   :  { %v1627_v34 = vpop.eup %1626 }
 0xb88   :  { %v873_v35 = vmul.f32 %v1627_v34, %v1883_v12 }
 0xb8a   :  { %v877_v36 = vadd.f32 %v873_v35, %v1892_v20 }
 0xb8c   :  { %889 = vrot.lane.b32.xlu2 %v877_v36, %s1827_s3  ;;  %v881_v14 = vmul.f32 %v877_v36, %v2174_v60 }
 0xb9e   :  { %v856_v37 = vpop.f32.mrf.mxu1 }
 0xb9f   :  { %v866_v38 = vadd.f32 %v856_v37, %v1890_v19 }
 0xba1   :  { %1628 = vtanh.f32 %v866_v38 }
 0xba7   :  { %v1629_v39 = vpop.eup %1628 }
 0xba8   :  { %v874_v40 = vmul.f32 %v1629_v39, %v1883_v12 }
 0xbaa   :  { %v878_v41 = vadd.f32 %v874_v40, %v1892_v20 }
 0xbac   :  { %891 = vrot.lane.b32.xlu0 %v878_v41, %s1827_s3  ;;  %v882_v21 = vmul.f32 %v878_v41, %v2179_v50 }
 0xbbe   :  { %v859_v42 = vpop.f32.mrf.mxu1 }
 0xbbf   :  { %v867_v44 = vadd.f32 %v859_v42, %v1899_v26 }
 0xbc1   :  { %1630 = vtanh.f32 %v867_v44 }
 0xbc6   :  { %v862_v46 = vpop.f32.mrf.mxu1 }
 0xbc7   :  { %v1631_v47 = vpop.eup %1630  ;;  %v868_v51 = vadd.f32 %v862_v46, %v1906_v32 }
 0xbc8   :  { %v875_v43 = vmul.f32 %v1631_v47, %v1883_v12 }
 0xbc9   :  { %1632 = vtanh.f32 %v868_v51 }
 0xbca   :  { %v879_v52 = vadd.f32 %v875_v43, %v1892_v20 }
 0xbcc   :  { %893 = vrot.lane.b32.xlu1 %v879_v52, %s1827_s3  ;;  %v883_v25 = vmul.f32 %v879_v52, %v2189_v16 }
 0xbcf   :  { %v1633_v53 = vpop.eup %1632 }
 0xbd0   :  { %v876_v56 = vmul.f32 %v1633_v53, %v1883_v12 }
 0xbd2   :  { %v880_v59 = vadd.f32 %v876_v56, %v1892_v20 }
 0xbd4   :  { %895 = vrot.lane.b32.xlu2 %v880_v59, %s1827_s3  ;;  %v884_v28 = vmul.f32 %v880_v59, %v2184_v10 }
 0xbe6   :  { %v890_v54 = vpop.permute.xlu2 %889 }
 0xbe7   :  { %v901_v62 = vmul.f32 %v890_v54, %v877_v36 }
 0xbe9   :  { %909 = vrot.lane.b32.xlu0 %v901_v62, %s1829_s16 }
 0xc1e   :  { %v892_v4 = vpop.permute.xlu0 %891 }
 0xc1f   :  { %v902_v7 = vmul.f32 %v892_v4, %v878_v41 }
 0xc21   :  { %911 = vrot.lane.b32.xlu1 %v902_v7, %s1829_s16 }
 0xc2e   :  { %v896_v49 = vpop.permute.xlu2 %895 }
 0xc2f   :  { %v904_v57 = vmul.f32 %v896_v49, %v880_v59 }
 0xc31   :  { %915 = vrot.lane.b32.xlu0 %v904_v57, %s1829_s16 }
 0xc3e   :  { %v894_v13 = vpop.permute.xlu1 %893 }
 0xc3f   :  { %v903_v55 = vmul.f32 %v894_v13, %v879_v52 }
 0xc41   :  { %913 = vrot.lane.b32.xlu2 %v903_v55, %s1829_s16 }
 0xc5b   :  { %v910_v17 = vpop.permute.xlu0 %909 }
 0xc5c   :  { %v2226_v18 = vadd.f32 %v910_v17, %v881_v14 }
 0xc5e   :  { %1634 = vtanh.f32 %v2226_v18 }
 0xc64   :  { %v1635_v58 = vpop.eup %1634 }
 0xc65   :  { %933 = vrot.lane.b32.xlu1 %v1635_v58, %s1827_s3 }
 0xc93   :  { %v912_v22 = vpop.permute.xlu1 %911 }
 0xc94   :  { %v2231_v23 = vadd.f32 %v912_v22, %v882_v21 }
 0xc96   :  { %1636 = vtanh.f32 %v2231_v23 }
 0xc9b   :  { %v914_v45 = vpop.permute.xlu2 %913 }
 0xc9c   :  { %v1637_v27 = vpop.eup %1636  ;;  %v2235_v60 = vadd.f32 %v914_v45, %v883_v25 }
 0xc9d   :  { %935 = vrot.lane.b32.xlu2 %v1637_v27, %s1827_s3 }
 0xc9e   :  { %1638 = vtanh.f32 %v2235_v60 }
 0xca3   :  { %v916_v24 = vpop.permute.xlu0 %915 }
 0xca4   :  { %v1639_v29 = vpop.eup %1638  ;;  %v2240_v50 = vadd.f32 %v916_v24, %v884_v28 }
 0xca5   :  { %937 = vrot.lane.b32.xlu0 %v1639_v29, %s1827_s3 }
 0xca6   :  { %1640 = vtanh.f32 %v2240_v50 }
 0xcac   :  { %v1641_v30 = vpop.eup %1640 }
 0xcad   :  { %939 = vrot.lane.b32.xlu1 %v1641_v30, %s1827_s3 }
 0xcd7   :  { %v934_v16 = vpop.permute.xlu1 %933 }
 0xcd8   :  { %v2245_v31 = vmul.f32 %v934_v16, %v877_v36 }
 0xcda   :  { %969 = vrot.lane.b32.xlu2 %v2245_v31, %s1829_s16 }
 0xcf7   :  { %v936_v33 = vpop.permute.xlu2 %935 }
 0xcf8   :  { %v2249_v34 = vmul.f32 %v936_v33, %v878_v41 }
 0xcfa   :  { %971 = vrot.lane.b32.xlu0 %v2249_v34, %s1829_s16 }
 0xd17   :  { %v938_v10 = vpop.permute.xlu0 %937 }
 0xd18   :  { %v2253_v35 = vmul.f32 %v938_v10, %v879_v52 }
 0xd1a   :  { %973 = vrot.lane.b32.xlu1 %v2253_v35, %s1829_s16 }
 0xd1f   :  { %v940_v37 = vpop.permute.xlu1 %939 }
 0xd20   :  { %v2257_v38 = vmul.f32 %v940_v37, %v880_v59 }
 0xd22   :  { %975 = vrot.lane.b32.xlu2 %v2257_v38, %s1829_s16 }
 0xd34   :  { %v970_v36 = vpop.permute.xlu2 %969 }
 0xd35   :  { %1524 = vmatmul.msk.f32.vlgmr.msrb.gmra.mxu2 %vm103_vm0, %v970_v36 }
 0xd6c   :  { %v972_v39 = vpop.permute.xlu0 %971 }
 0xd6d   :  { %1525 = vmatmul.msk.f32.gmra.mxu2 %vm103_vm0, %v972_v39 }
 0xd7c   :  { %v976_v41 = vpop.permute.xlu2 %975 }
 0xd8c   :  { %v974_v40 = vpop.permute.xlu1 %973 }
 0xd8d   :  { %1526 = vmatmul.msk.f32.gmra.mxu2 %vm103_vm0, %v974_v40 }
 0xd95   :  { %1527 = vmatmul.msk.f32.gmra.mxu2 %vm103_vm0, %v976_v41 }
 0xdb8   :  { %v1002_v42 = vpop.f32.mrf.mxu2 }
 0xdb9   :  { %v1014_v44 = vadd.f32 %v1002_v42, %v1886_v15 }
 0xdbb   :  { %1642 = vtanh.f32 %v1014_v44 }
 0xdc1   :  { %v1643_v46 = vpop.eup %1642 }
 0xdc2   :  { %v1022_v47 = vmul.f32 %v1643_v46, %v1883_v12 }
 0xdc4   :  { %v1026_v51 = vadd.f32 %v1022_v47, %v1892_v20 }
 0xdc6   :  { %1038 = vrot.lane.b32.xlu0 %v1026_v51, %s1827_s3  ;;  %v1030_v29 = vmul.f32 %v1026_v51, %v2226_v18 }
 0xdf0   :  { %v1005_v43 = vpop.f32.mrf.mxu2 }
 0xdf1   :  { %v1015_v52 = vadd.f32 %v1005_v43, %v1890_v19 }
 0xdf3   :  { %1644 = vtanh.f32 %v1015_v52 }
 0xdf9   :  { %v1645_v53 = vpop.eup %1644 }
 0xdfa   :  { %v1023_v56 = vmul.f32 %v1645_v53, %v1883_v12 }
 0xdfc   :  { %v1027_v59 = vadd.f32 %v1023_v56, %v1892_v20 }
 0xdfe   :  { %1040 = vrot.lane.b32.xlu1 %v1027_v59, %s1827_s3  ;;  %v1031_v10 = vmul.f32 %v1027_v59, %v2231_v23 }
 0xe10   :  { %v1008_v54 = vpop.f32.mrf.mxu2 }
 0xe11   :  { %v1016_v62 = vadd.f32 %v1008_v54, %v1899_v26 }
 0xe13   :  { %1646 = vtanh.f32 %v1016_v62 }
 0xe18   :  { %v1011_v4 = vpop.f32.mrf.mxu2 }
 0xe19   :  { %v1647_v7 = vpop.eup %1646  ;;  %v1017_v49 = vadd.f32 %v1011_v4, %v1906_v32 }
 0xe1a   :  { %v1024_v57 = vmul.f32 %v1647_v7, %v1883_v12 }
 0xe1b   :  { %1648 = vtanh.f32 %v1017_v49 }
 0xe1c   :  { %v1028_v13 = vadd.f32 %v1024_v57, %v1892_v20 }
 0xe1e   :  { %1042 = vrot.lane.b32.xlu2 %v1028_v13, %s1827_s3  ;;  %v1032_v18 = vmul.f32 %v1028_v13, %v2235_v60 }
 0xe21   :  { %v1649_v55 = vpop.eup %1648 }
 0xe22   :  { %v1025_v14 = vmul.f32 %v1649_v55, %v1883_v12 }
 0xe24   :  { %v1029_v17 = vadd.f32 %v1025_v14, %v1892_v20 }
 0xe26   :  { %1044 = vrot.lane.b32.xlu0 %v1029_v17, %s1827_s3  ;;  %v1033_v23 = vmul.f32 %v1029_v17, %v2240_v50 }
 0xe38   :  { %v1039_v58 = vpop.permute.xlu0 %1038 }
 0xe39   :  { %v1050_v21 = vmul.f32 %v1039_v58, %v1026_v51 }
 0xe3b   :  { %1058 = vrot.lane.b32.xlu1 %v1050_v21, %s1829_s16 }
 0xe70   :  { %v1041_v22 = vpop.permute.xlu1 %1040 }
 0xe71   :  { %v1051_v25 = vmul.f32 %v1041_v22, %v1027_v59 }
 0xe73   :  { %1060 = vrot.lane.b32.xlu2 %v1051_v25, %s1829_s16 }
 0xe78   :  { %v1043_v45 = vpop.permute.xlu2 %1042 }
 0xe79   :  { %v1052_v27 = vmul.f32 %v1043_v45, %v1028_v13 }
 0xe7b   :  { %1062 = vrot.lane.b32.xlu0 %v1052_v27, %s1829_s16 }
 0xe98   :  { %v1045_v28 = vpop.permute.xlu0 %1044 }
 0xe99   :  { %v1053_v24 = vmul.f32 %v1045_v28, %v1029_v17 }
 0xe9b   :  { %1064 = vrot.lane.b32.xlu1 %v1053_v24, %s1829_s16 }
 0xead   :  { %v1059_v30 = vpop.permute.xlu1 %1058 }
 0xeae   :  { %v2286_v16 = vadd.f32 %v1059_v30, %v1030_v29 }
 0xeb0   :  { %1650 = vtanh.f32 %v2286_v16 }
 0xeb6   :  { %v1651_v33 = vpop.eup %1650 }
 0xeb7   :  { %1082 = vrot.lane.b32.xlu2 %v1651_v33, %s1827_s3 }
 0xecd   :  { %v1061_v37 = vpop.permute.xlu2 %1060 }
 0xece   :  { %v2291_v36 = vadd.f32 %v1061_v37, %v1031_v10 }
 0xed0   :  { %1652 = vtanh.f32 %v2291_v36 }
 0xed6   :  { %v1653_v39 = vpop.eup %1652 }
 0xed7   :  { %1084 = vrot.lane.b32.xlu0 %v1653_v39, %s1827_s3 }
 0xeed   :  { %v1063_v40 = vpop.permute.xlu0 %1062 }
 0xeee   :  { %v2296_v41 = vadd.f32 %v1063_v40, %v1032_v18  ;;  %v1287_v40 = vld [vmem:[#allocation9 + $0xe0] sm:$0xff] }
 0xef0   :  { %1654 = vtanh.f32 %v2296_v41 }
 0xef6   :  { %v1655_v42 = vpop.eup %1654 }
 0xef7   :  { %1086 = vrot.lane.b32.xlu1 %v1655_v42, %s1827_s3  ;;  %v1288_v42 = vld [vmem:[#allocation9 + $0xe8] sm:$0xff] }
 0xf0d   :  { %v1065_v44 = vpop.permute.xlu1 %1064 }
 0xf0e   :  { %v2301_v46 = vadd.f32 %v1065_v44, %v1033_v23  ;;  %v1285_v23 = vld [vmem:[#allocation9 + $0xd0] sm:$0xff]  ;;  %v1286_v44 = vld [vmem:[#allocation9 + $0xd8] sm:$0xff] }
 0xf10   :  { %1656 = vtanh.f32 %v2301_v46 }
 0xf11   :  { %v1083_v47 = vpop.permute.xlu2 %1082 }
 0xf12   :  { %v1094_v43 = vmul.f32 %v1083_v47, %v1026_v51 }
 0xf14   :  { %1118 = vrot.lane.b32.xlu0 %v1094_v43, %s1829_s16 }
 0xf16   :  { %v1657_v60 = vpop.eup %1656 }
 0xf17   :  { %1088 = vrot.lane.b32.xlu2 %v1657_v60, %s1827_s3  ;;  %v1281_v60 = vld [vmem:[#allocation9 + $0xb0] sm:$0xff] }
 0xf49   :  { %v1085_v52 = vpop.permute.xlu0 %1084 }
 0xf4a   :  { %v1095_v53 = vmul.f32 %v1085_v52, %v1027_v59  ;;  %v1282_v52 = vld [vmem:[#allocation9 + $0xb8] sm:$0xff] }
 0xf4c   :  { %1120 = vrot.lane.b32.xlu1 %v1095_v53, %s1829_s16 }
 0xf69   :  { %v1087_v56 = vpop.permute.xlu1 %1086 }
 0xf6a   :  { %v2307_v54 = vmul.f32 %v1087_v56, %v1028_v13  ;;  %v1280_v56 = vld [vmem:[#allocation9 + $0xa8] sm:$0xff] }
 0xf6c   :  { %1122 = vrot.lane.b32.xlu2 %v2307_v54, %s1829_s16 }
 0xf71   :  { %v1089_v50 = vpop.permute.xlu2 %1088 }
 0xf72   :  { %v2311_v62 = vmul.f32 %v1089_v50, %v1029_v17  ;;  %v1278_v50 = vld [vmem:[#allocation9 + $0x98] sm:$0xff] }
 0xf74   :  { %1124 = vrot.lane.b32.xlu0 %v2311_v62, %s1829_s16 }
 0xf86   :  { %v1119_v51 = vpop.permute.xlu0 %1118 }
 0xf87   :  { %1528 = vmatmul.msk.f32.vlgmr.msrb.gmra.mxu3 %vm103_vm0, %v1119_v51 }
 0xfbe   :  { %v1121_v4 = vpop.permute.xlu1 %1120 }
 0xfbf   :  { %1529 = vmatmul.msk.f32.gmra.mxu3 %vm103_vm0, %v1121_v4  ;;  %v1276_v4 = vld [vmem:[#allocation9 + $0x88] sm:$0xff] }
 0xfc6   :  { %v1123_v59 = vpop.permute.xlu2 %1122 }
 0xfc7   :  { %1530 = vmatmul.msk.f32.gmra.mxu3 %vm103_vm0, %v1123_v59  ;;  %v1273_v59 = vld [vmem:[#allocation9 + $0x70] sm:$0xff] }
 0xfe6   :  { %v1125_v7 = vpop.permute.xlu0 %1124 }
 0xfe7   :  { %1531 = vmatmul.msk.f32.gmra.mxu3 %vm103_vm0, %v1125_v7  ;;  %v1274_v7 = vld [vmem:[#allocation9 + $0x78] sm:$0xff] }
0x100a   :  { %v1151_v49 = vpop.f32.mrf.mxu3 }
0x100b   :  { %v1163_v57 = vadd.f32 %v1151_v49, %v1886_v15  ;;  %v1271_v49 = vld [vmem:[#allocation9 + $0x60] sm:$0xff] }
0x100d   :  { %1658 = vtanh.f32 %v1163_v57  ;;  %v1272_v57 = vld [vmem:[#allocation9 + $0x68] sm:$0xff] }
0x1013   :  { %v1659_v13 = vpop.eup %1658 }
0x1014   :  { %v1171_v55 = vmul.f32 %v1659_v13, %v1883_v12  ;;  %v1269_v13 = vld [vmem:[#allocation9 + $0x50] sm:$0xff] }
0x1016   :  { %v2322_v14 = vadd.f32 %v1171_v55, %v1892_v20  ;;  %v1270_v55 = vld [vmem:[#allocation9 + $0x58] sm:$0xff] }
0x1018   :  { %1187 = vrot.lane.b32.xlu1 %v2322_v14, %s1827_s3 }
0x1042   :  { %v1154_v17 = vpop.f32.mrf.mxu3 }
0x1043   :  { %v1164_v58 = vadd.f32 %v1154_v17, %v1890_v19  ;;  %v1267_v17 = vld [vmem:[#allocation9 + $0x40] sm:$0xff] }
0x1045   :  { %1660 = vtanh.f32 %v1164_v58  ;;  %v1268_v58 = vld [vmem:[#allocation9 + $0x48] sm:$0xff] }
0x104a   :  { %v1157_v21 = vpop.f32.mrf.mxu3 }
0x104b   :  { %v1661_v22 = vpop.eup %1660  ;;  %v1165_v25 = vadd.f32 %v1157_v21, %v1899_v26  ;;  %v1265_v21 = vld [vmem:[#allocation9 + $0x30] sm:$0xff] }
0x104c   :  { %v1172_v15 = vmul.f32 %v1661_v22, %v1883_v12  ;;  %v1266_v22 = vld [vmem:[#allocation9 + $0x38] sm:$0xff] }
0x104d   :  { %1662 = vtanh.f32 %v1165_v25  ;;  %v1263_v25 = vld [vmem:[#allocation9 + $0x20] sm:$0xff] }
0x104e   :  { %v2330_v45 = vadd.f32 %v1172_v15, %v1892_v20  ;;  %v1264_v15 = vld [vmem:[#allocation9 + $0x28] sm:$0xff] }
0x1050   :  { %1189 = vrot.lane.b32.xlu2 %v2330_v45, %s1827_s3 }
0x1053   :  { %v1663_v27 = vpop.eup %1662 }
0x1054   :  { %v1173_v28 = vmul.f32 %v1663_v27, %v1883_v12  ;;  %v1261_v27 = vld [vmem:[#allocation9 + $0x10] sm:$0xff] }
0x1056   :  { %v2336_v24 = vadd.f32 %v1173_v28, %v1892_v20  ;;  %v1262_v28 = vld [vmem:[#allocation9 + $0x18] sm:$0xff] }
0x1058   :  { %1191 = vrot.lane.b32.xlu0 %v2336_v24, %s1827_s3 }
0x106a   :  { %v1160_v19 = vpop.f32.mrf.mxu3 }
0x106b   :  { %v1166_v26 = vadd.f32 %v1160_v19, %v1906_v32  ;;  %v1260_v19 = vld [vmem:[#allocation9 + $0x8] sm:$0xff] }
0x106d   :  { %1664 = vtanh.f32 %v1166_v26  ;;  %v1180_v26 = vmul.f32 %v2330_v45, %v2291_v36 }
0x1073   :  { %v1665_v29 = vpop.eup %1664 }
0x1074   :  { %v1174_v30 = vmul.f32 %v1665_v29, %v1883_v12 }
0x1076   :  { %v2343_v33 = vadd.f32 %v1174_v30, %v1892_v20 }
0x1078   :  { %1193 = vrot.lane.b32.xlu1 %v2343_v33, %s1827_s3 }
0x108a   :  { %v1188_v10 = vpop.permute.xlu1 %1187 }
0x108b   :  { %v1199_v37 = vmul.f32 %v1188_v10, %v2322_v14 }
0x108d   :  { %1207 = vrot.lane.b32.xlu2 %v1199_v37, %s1829_s16 }
0x10aa   :  { %v1190_v39 = vpop.permute.xlu2 %1189 }
0x10ab   :  { %v1200_v18 = vmul.f32 %v1190_v39, %v2330_v45  ;;  %v1322_v39 = vld [vmem:[#allocation9 + $0x1f8] sm:$0xff] }
0x10ac   :  { %1410 = vmatpush.msra.mxu3 %v1322_v39 }
0x10ad   :  { %1209 = vrot.lane.b32.xlu0 %v1200_v18, %s1829_s16  ;;  %v1319_v18 = vld [vmem:[#allocation9 + $0x1e0] sm:$0xff] }
0x10b5   :  { %374 = vrot.lane.b32.xlu0 %v2012_v61, %s1827_s3 }
0x10bd   :  { %524 = vrot.lane.b32.xlu0 %v2073_v48, %s1828_s15  ;;  %v1289_v48 = vld [vmem:[#allocation9 + $0xf0] sm:$0xff] }
0x10be   :  { %1323 = vmatpush.msra.mxu0 %v1289_v48  ;;  %v1316_v48 = vld [vmem:[#allocation9 + $0x1c8] sm:$0xff] }
0x10c0   :  { %1324 = vmatpush.msra.mxu0 %v1287_v40  ;;  %v1314_v40 = vld [vmem:[#allocation9 + $0x1b8] sm:$0xff] }
0x10c2   :  { %1325 = vmatpush.msra.mxu0 %v1285_v23  ;;  %v1309_v23 = vld [vmem:[#allocation9 + $0x190] sm:$0xff] }
0x10c5   :  { %955 = vrot.lane.b32.xlu0 %v2249_v34, %s1827_s3  ;;  %v1290_v34 = vld [vmem:[#allocation9 + $0xf8] sm:$0xff] }
0x10c6   :  { %1381 = vmatpush.msra.mxu2 %v1290_v34  ;;  %v1313_v34 = vld [vmem:[#allocation9 + $0x1b0] sm:$0xff] }
0x10c8   :  { %1382 = vmatpush.msra.mxu2 %v1288_v42  ;;  %v1311_v42 = vld [vmem:[#allocation9 + $0x1a0] sm:$0xff] }
0x10ca   :  { %v1192_v12 = vpop.permute.xlu0 %1191  ;;  %1383 = vmatpush.msra.mxu2 %v1286_v44  ;;  %v1310_v44 = vld [vmem:[#allocation9 + $0x198] sm:$0xff] }
0x10cb   :  { %v1201_v20 = vmul.f32 %v1192_v12, %v2336_v24  ;;  %v1320_v12 = vld [vmem:[#allocation9 + $0x1e8] sm:$0xff] }
0x10cc   :  { %1411 = vmatpush.msra.mxu3 %v1320_v12 }
0x10cd   :  { %1104 = vrot.lane.b32.xlu0 %v1095_v53, %s1828_s15  ;;  %1211 = vrot.lane.b32.xlu1 %v1201_v20, %s1829_s16  ;;  %v1279_v53 = vld [vmem:[#allocation9 + $0xa0] sm:$0xff]  ;;  %v1317_v20 = vld [vmem:[#allocation9 + $0x1d0] sm:$0xff] }
0x10d5   :  { %953 = vrot.lane.b32.xlu1 %v2245_v31, %s1827_s3 }
0x10dd   :  { %1102 = vrot.lane.b32.xlu1 %v1094_v43, %s1828_s15  ;;  %v1284_v43 = vld [vmem:[#allocation9 + $0xc8] sm:$0xff] }
0x10de   :  { %1384 = vmatpush.msra.mxu2 %v1284_v43  ;;  %v1306_v43 = vld [vmem:[#allocation9 + $0x178] sm:$0xff] }
0x10e0   :  { %1385 = vmatpush.msra.mxu2 %v1282_v52  ;;  %v1304_v52 = vld [vmem:[#allocation9 + $0x168] sm:$0xff] }
0x10e2   :  { %1386 = vmatpush.msra.mxu2 %v1280_v56  ;;  %v1301_v56 = vld [vmem:[#allocation9 + $0x150] sm:$0xff] }
0x10e4   :  { %1387 = vmatpush.msra.mxu2 %v1278_v50 }
0x10e5   :  { %378 = vrot.lane.b32.xlu1 %v2016_v63, %s1827_s3  ;;  %v1179_v63 = vmul.f32 %v2322_v14, %v2286_v16  ;;  %v1277_v16 = vld [vmem:[#allocation9 + $0x90] sm:$0xff] }
0x10e6   :  { %1388 = vmatpush.msra.mxu2 %v1276_v4  ;;  %v1300_v4 = vld [vmem:[#allocation9 + $0x148] sm:$0xff] }
0x10e7   :  { %v1208_v31 = vpop.permute.xlu2 %1207 }
0x10e8   :  { %v1219_v47 = vadd.f32 %v1208_v31, %v1179_v63  ;;  %1389 = vmatpush.msra.mxu2 %v1274_v7  ;;  %v1312_v31 = vld [vmem:[#allocation9 + $0x1a8] sm:$0xff]  ;;  %v1295_v7 = vld [vmem:[#allocation9 + $0x120] sm:$0xff] }
0x10ea   :  { %v1194_v32 = vpop.permute.xlu1 %1193  ;;  %1666 = vtanh.f32 %v1219_v47  ;;  %1390 = vmatpush.msra.mxu2 %v1272_v57  ;;  %v1308_v47 = vld [vmem:[#allocation9 + $0x188] sm:$0xff]  ;;  %v1182_v57 = vmul.f32 %v2343_v33, %v2301_v46 }
0x10eb   :  { %v1202_v61 = vmul.f32 %v1194_v32, %v2343_v33  ;;  %v1318_v32 = vld [vmem:[#allocation9 + $0x1d8] sm:$0xff] }
0x10ec   :  { %1391 = vmatpush.msra.mxu2 %v1270_v55  ;;  %1412 = vmatpush.msra.mxu3 %v1318_v32 }
0x10ed   :  { %1213 = vrot.lane.b32.xlu2 %v1202_v61, %s1829_s16  ;;  %v1315_v61 = vld [vmem:[#allocation9 + $0x1c0] sm:$0xff] }
0x10ee   :  { %1392 = vmatpush.msra.mxu2 %v1268_v58  ;;  %1413 = vmatpush.msra.mxu3 %v1316_v48 }
0x10f0   :  { %v1667_v51 = vpop.eup %1666  ;;  %1393 = vmatpush.msra.mxu2 %v1266_v22  ;;  %1414 = vmatpush.msra.mxu3 %v1314_v40  ;;  %v1291_v22 = vld [vmem:[#allocation9 + $0x100] sm:$0xff] }
0x10f2   :  { %1394 = vmatpush.msra.mxu2 %v1264_v15  ;;  %1415 = vmatpush.msra.mxu3 %v1312_v31 }
0x10f4   :  { %1395 = vmatpush.msra.mxu2 %v1262_v28  ;;  %1416 = vmatpush.msra.mxu3 %v1310_v44 }
0x10f5   :  { %376 = vrot.lane.b32.xlu2 %v2021_v1, %s1827_s3  ;;  %v1283_v1 = vld [vmem:[#allocation9 + $0xc0] sm:$0xff] }
0x10f6   :  { %1326 = vmatpush.msra.mxu0 %v1283_v1  ;;  %1396 = vmatpush.msra.mxu2 %v1260_v19  ;;  %v1305_v1 = vld [vmem:[#allocation9 + $0x170] sm:$0xff] }
0x10f7   :  { %1417 = vmatpush.msra.mxu3 %v1308_v47 }
0x10f8   :  { %1327 = vmatpush.msra.mxu0 %v1281_v60  ;;  %v1303_v60 = vld [vmem:[#allocation9 + $0x160] sm:$0xff] }
0x10f9   :  { %1418 = vmatpush.msra.mxu3 %v1306_v43 }
0x10fa   :  { %1328 = vmatpush.msra.mxu0 %v1279_v53  ;;  %v1181_v53 = vmul.f32 %v2336_v24, %v2296_v41  ;;  %v1298_v41 = vld [vmem:[#allocation9 + $0x138] sm:$0xff] }
0x10fb   :  { %1419 = vmatpush.msra.mxu3 %v1304_v52 }
0x10fc   :  { %1329 = vmatpush.msra.mxu0 %v1277_v16 }
0x10fd   :  { %526 = vrot.lane.b32.xlu2 %v2077_v0, %s1828_s15  ;;  %v1275_v0 = vld [vmem:[#allocation9 + $0x80] sm:$0xff] }
0x10fe   :  { %1330 = vmatpush.msra.mxu0 %v1275_v0  ;;  %v1299_v0 = vld [vmem:[#allocation9 + $0x140] sm:$0xff] }
0x1100   :  { %1331 = vmatpush.msra.mxu0 %v1273_v59  ;;  %v1297_v59 = vld [vmem:[#allocation9 + $0x130] sm:$0xff] }
0x1102   :  { %1332 = vmatpush.msra.mxu0 %v1271_v49  ;;  %v1296_v49 = vld [vmem:[#allocation9 + $0x128] sm:$0xff] }
0x1104   :  { %1333 = vmatpush.msra.mxu0 %v1269_v13  ;;  %v1293_v13 = vld [vmem:[#allocation9 + $0x110] sm:$0xff] }
0x1105   :  { %1231 = vrot.lane.b32.xlu2 %v1667_v51, %s1827_s3 }
0x1106   :  { %1334 = vmatpush.msra.mxu0 %v1267_v17 }
0x1108   :  { %1335 = vmatpush.msra.mxu0 %v1265_v21 }
0x110a   :  { %1336 = vmatpush.msra.mxu0 %v1263_v25  ;;  %v1292_v25 = vld [vmem:[#allocation9 + $0x108] sm:$0xff] }
0x110c   :  { %1337 = vmatpush.msra.mxu0 %v1261_v27 }
0x110d   :  { %957 = vrot.lane.b32.xlu2 %v2253_v35, %s1827_s3  ;;  %v1259_v35 = vld [vmem:[#allocation9] sm:$0xff] }
0x110e   :  { %1338 = vmatpush.msra.mxu0 %v1259_v35 }
0x1115   :  { %1106 = vrot.lane.b32.xlu2 %v2307_v54, %s1828_s15  ;;  %v1321_v54 = vld [vmem:[#allocation9 + $0x1f0] sm:$0xff] }
0x1116   :  { %1352 = vmatpush.msra.mxu1 %v1321_v54 }
0x1118   :  { %1353 = vmatpush.msra.mxu1 %v1319_v18 }
0x111a   :  { %1354 = vmatpush.msra.mxu1 %v1317_v20 }
0x111c   :  { %1355 = vmatpush.msra.mxu1 %v1315_v61 }
0x111e   :  { %1356 = vmatpush.msra.mxu1 %v1313_v34 }
0x111f   :  { %v1210_v29 = vpop.permute.xlu0 %1209 }
0x1120   :  { %v1220_v30 = vadd.f32 %v1210_v29, %v1180_v26  ;;  %1357 = vmatpush.msra.mxu1 %v1311_v42 }
0x1122   :  { %1668 = vtanh.f32 %v1220_v30  ;;  %1358 = vmatpush.msra.mxu1 %v1309_v23 }
0x1127   :  { %v375_v10 = vpop.permute.xlu0 %374 }
0x1128   :  { %v1669_v37 = vpop.eup %1668  ;;  %387 = vst.msk [vmem:[#allocation2] sm:$0xff] %vm386_vm4, %v375_v10 }
0x1129   :  { %1233 = vrot.lane.b32.xlu1 %v1669_v37, %s1827_s3 }
0x112f   :  { %v525_v36 = vpop.permute.xlu0 %524 }
0x1130   :  { %537 = vst.msk [vmem:[#allocation2] sm:$0xff] %vm536_vm5, %v525_v36 }
0x1131   :  { %671 = vst.msk [vmem:[#allocation2] sm:$0xff] %vm670_vm6, %v2133_v6  ;;  %528 = vrot.lane.b32.xlu1 %v2081_v2, %s1828_s15  ;;  %v1307_v2 = vld [vmem:[#allocation9 + $0x180] sm:$0xff] }
0x1132   :  { %1359 = vmatpush.msra.mxu1 %v1307_v2 }
0x1134   :  { %1360 = vmatpush.msra.mxu1 %v1305_v1 }
0x1136   :  { %1361 = vmatpush.msra.mxu1 %v1303_v60 }
0x1137   :  { %v956_v63 = vpop.permute.xlu0 %955 }
0x1138   :  { %966 = vst.msk [vmem:[#allocation2 + $0x18] sm:$0xff] %vm386_vm4, %v956_v63  ;;  %v1251_v6 = vld [vmem:[#allocation2] sm:$0xff]  ;;  %1362 = vmatpush.msra.mxu1 %v1301_v56 }
0x1139   :  { %959 = vrot.lane.b32.xlu1 %v2257_v38, %s1827_s3  ;;  %1339 = vmatmul.f32.vlgmr.msra.gmra.mxu0 %v1251_v6  ;;  %v1302_v38 = vld [vmem:[#allocation9 + $0x158] sm:$0xff] }
0x113a   :  { %1397 = vmatmul.f32.vlgmr.msra.gmra.mxu2 %v1251_v6  ;;  %1420 = vmatpush.msra.mxu3 %v1302_v38 }
0x113b   :  { %1363 = vmatpush.msra.mxu1 %v1299_v0 }
0x113c   :  { %1421 = vmatpush.msra.mxu3 %v1300_v4 }
0x113d   :  { %1364 = vmatpush.msra.mxu1 %v1297_v59 }
0x113e   :  { %1422 = vmatpush.msra.mxu3 %v1298_v41 }
0x113f   :  { %v1212_v16 = vpop.permute.xlu1 %1211  ;;  %v1105_v50 = vpop.permute.xlu0 %1104  ;;  %1365 = vmatpush.msra.mxu1 %v1295_v7 }
0x1140   :  { %v1221_v51 = vadd.f32 %v1212_v16, %v1181_v53  ;;  %1115 = vst.msk [vmem:[#allocation2 + $0x18] sm:$0xff] %vm536_vm5, %v1105_v50  ;;  %1423 = vmatpush.msra.mxu3 %v1296_v49 }
0x1141   :  { %1108 = vrot.lane.b32.xlu1 %v2311_v62, %s1828_s15  ;;  %v1294_v62 = vld [vmem:[#allocation9 + $0x118] sm:$0xff]  ;;  %1366 = vmatpush.msra.mxu1 %v1293_v13 }
0x1142   :  { %1670 = vtanh.f32 %v1221_v51  ;;  %1424 = vmatpush.msra.mxu3 %v1294_v62 }
0x1143   :  { %1367 = vmatpush.msra.mxu1 %v1291_v22 }
0x1144   :  { %1425 = vmatpush.msra.mxu3 %v1292_v25 }
0x1147   :  { %v1214_v55 = vpop.permute.xlu2 %1213  ;;  %v954_v17 = vpop.permute.xlu1 %953 }
0x1148   :  { %v1671_v58 = vpop.eup %1670  ;;  %v1222_v21 = vadd.f32 %v1214_v55, %v1182_v57  ;;  %965 = vst.msk [vmem:[#allocation2 + $0x8] sm:$0xff] %vm386_vm4, %v954_v17 }
0x1149   :  { %1235 = vrot.lane.b32.xlu0 %v1671_v58, %s1827_s3 }
0x114a   :  { %1672 = vtanh.f32 %v1222_v21 }
0x114f   :  { %v377_v46 = vpop.permute.xlu2 %376  ;;  %v1103_v15 = vpop.permute.xlu1 %1102 }
0x1150   :  { %v1673_v27 = vpop.eup %1672  ;;  %388 = vst.msk [vmem:[#allocation2 + $0x10] sm:$0xff] %vm386_vm4, %v377_v46 }
0x1151   :  { %1114 = vst.msk [vmem:[#allocation2 + $0x8] sm:$0xff] %vm536_vm5, %v1103_v15  ;;  %1237 = vrot.lane.b32.xlu2 %v1673_v27, %s1827_s3  ;;  %380 = vrot.lane.b32.xlu0 %v2025_v3, %s1827_s3 }
0x1157   :  { %v527_v28 = vpop.permute.xlu2 %526  ;;  %v379_v35 = vpop.permute.xlu1 %378 }
0x1158   :  { %538 = vst.msk [vmem:[#allocation2 + $0x10] sm:$0xff] %vm536_vm5, %v527_v28 }
0x1159   :  { %672 = vst.msk [vmem:[#allocation2 + $0x10] sm:$0xff] %vm670_vm6, %v2137_v8  ;;  %530 = vrot.lane.b32.xlu0 %v2085_v5, %s1828_s15 }
0x115a   :  { %389 = vst.msk [vmem:[#allocation2 + $0x20] sm:$0xff] %vm386_vm4, %v379_v35 }
0x115f   :  { %v1232_v19 = vpop.permute.xlu2 %1231 }
0x1160   :  { %v1243_v26 = vmul.f32 %v1232_v19, %v2322_v14  ;;  %v1253_v29 = vld [vmem:[#allocation2 + $0x10] sm:$0xff] }
0x1161   :  { %1342 = vmatmul.f32.gmra.mxu0 %v1253_v29  ;;  %1400 = vmatmul.f32.gmra.mxu2 %v1253_v29 }
0x1162   :  { %1247 = vst.msk [vmem:[#allocation2 + $0x8] sm:$0xff] %vm670_vm6, %v1243_v26 }
0x1167   :  { %v958_v3 = vpop.permute.xlu2 %957 }
0x1168   :  { %967 = vst.msk [vmem:[#allocation2 + $0x28] sm:$0xff] %vm386_vm4, %v958_v3 }
0x1169   :  { %v1252_v30 = vld [vmem:[#allocation2 + $0x8] sm:$0xff] }
0x116a   :  { %1368 = vmatmul.f32.vlgmr.msra.gmra.mxu1 %v1252_v30  ;;  %1426 = vmatmul.f32.vlgmr.msra.gmra.mxu3 %v1252_v30 }
0x116f   :  { %v1107_v8 = vpop.permute.xlu2 %1106 }
0x1170   :  { %1116 = vst.msk [vmem:[#allocation2 + $0x28] sm:$0xff] %vm536_vm5, %v1107_v8 }
0x119b   :  { %v1234_v5 = vpop.permute.xlu1 %1233 }
0x119c   :  { %v1244_v10 = vmul.f32 %v1234_v5, %v2330_v45 }
0x119e   :  { %1248 = vst.msk [vmem:[#allocation2 + $0x18] sm:$0xff] %vm670_vm6, %v1244_v10 }
0x11a3   :  { %v529_v14 = vpop.permute.xlu1 %528 }
0x11a4   :  { %539 = vst.msk [vmem:[#allocation2 + $0x20] sm:$0xff] %vm536_vm5, %v529_v14 }
0x11a5   :  { %673 = vst.msk [vmem:[#allocation2 + $0x20] sm:$0xff] %vm670_vm6, %v2141_v9  ;;  %v1254_v37 = vld [vmem:[#allocation2 + $0x18] sm:$0xff] }
0x11a6   :  { %1371 = vmatmul.f32.gmra.mxu1 %v1254_v37  ;;  %1429 = vmatmul.f32.gmra.mxu3 %v1254_v37 }
0x11ab   :  { %v960_v54 = vpop.permute.xlu1 %959  ;;  %v1238_v18 = vpop.permute.xlu2 %1237 }
0x11ac   :  { %968 = vst.msk [vmem:[#allocation2 + $0x38] sm:$0xff] %vm386_vm4, %v960_v54  ;;  %v1255_v39 = vld [vmem:[#allocation2 + $0x20] sm:$0xff]  ;;  %v1246_v45 = vmul.f32 %v1238_v18, %v2343_v33 }
0x11ad   :  { %1345 = vmatmul.f32.gmra.mxu0 %v1255_v39  ;;  %1403 = vmatmul.f32.gmra.mxu2 %v1255_v39 }
0x11b3   :  { %v1109_v12 = vpop.permute.xlu1 %1108 }
0x11b4   :  { %1117 = vst.msk [vmem:[#allocation2 + $0x38] sm:$0xff] %vm536_vm5, %v1109_v12 }
0x11b5   :  { %1250 = vst.msk [vmem:[#allocation2 + $0x38] sm:$0xff] %vm670_vm6, %v1246_v45 }
0x11bb   :  { %v1236_v20 = vpop.permute.xlu0 %1235 }
0x11bc   :  { %v1245_v9 = vmul.f32 %v1236_v20, %v2336_v24  ;;  %v1258_v33 = vld [vmem:[#allocation2 + $0x38] sm:$0xff]  ;;  %v1340_v24 = vpop.f32.mrf.mxu0 }
0x11bd   :  { %v1398_v31 = vpop.f32.mrf.mxu2 }
0x11be   :  { %1249 = vst.msk [vmem:[#allocation2 + $0x28] sm:$0xff] %vm670_vm6, %v1245_v9 }
0x11c3   :  { %v381_v32 = vpop.permute.xlu0 %380 }
0x11c4   :  { %390 = vst.msk [vmem:[#allocation2 + $0x30] sm:$0xff] %vm386_vm4, %v381_v32 }
0x11c5   :  { %v1256_v36 = vld [vmem:[#allocation2 + $0x28] sm:$0xff] }
0x11c6   :  { %1374 = vmatmul.f32.gmra.mxu1 %v1256_v36  ;;  %1432 = vmatmul.f32.gmra.mxu3 %v1256_v36 }
0x11cb   :  { %v531_v61 = vpop.permute.xlu0 %530 }
0x11cc   :  { %540 = vst.msk [vmem:[#allocation2 + $0x30] sm:$0xff] %vm536_vm5, %v531_v61 }
0x11cd   :  { %674 = vst.msk [vmem:[#allocation2 + $0x30] sm:$0xff] %vm670_vm6, %v2145_v11 }
0x11ce   :  { %1377 = vmatmul.f32.gmra.mxu1 %v1258_v33  ;;  %1435 = vmatmul.f32.gmra.mxu3 %v1258_v33 }
0x11d4   :  { %v1257_v48 = vld [vmem:[#allocation2 + $0x30] sm:$0xff] }
0x11d5   :  { %1348 = vmatmul.f32.gmra.mxu0 %v1257_v48  ;;  %1406 = vmatmul.f32.gmra.mxu2 %v1257_v48 }
0x11de   :  { %v1343_v60 = vpop.f32.mrf.mxu0 }
0x11e4   :  { %v1401_v16 = vpop.f32.mrf.mxu2 }
0x11e7   :  { %v1369_v34 = vpop.f32.mrf.mxu1 }
0x11e8   :  { %v1370_v40 = vadd.f32 %v1369_v34, %v1340_v24 }
0x11ea   :  { %v1439_v42 = vmul.f32 0.5, %v1370_v40 }
0x11ec   :  { %1674 = vtanh.f32 %v1439_v42 }
0x11ed   :  { %v1427_v23 = vpop.f32.mrf.mxu3 }
0x11ee   :  { %v1428_v44 = vadd.f32 %v1427_v23, %v1398_v31 }
0x11f0   :  { %v1440_v63 = vmul.f32 0.5, %v1428_v44 }
0x11f2   :  { %v1675_v6 = vpop.eup %1674  ;;  %1676 = vtanh.f32 %v1440_v63 }
0x11f3   :  { %v1455_v2 = vmul.f32 0.5, %v1675_v6 }
0x11f5   :  { %v1463_v47 = vadd.f32 0.5, %v1455_v2 }
0x11f7   :  { %1471 = vst [vmem:[#allocation11] sm:$0xff] %v1463_v47 }
0x11f8   :  { %v1677_v11 = vpop.eup %1676 }
0x11f9   :  { %v1456_v1 = vmul.f32 0.5, %v1677_v11 }
0x11fb   :  { %v1464_v43 = vadd.f32 0.5, %v1456_v1 }
0x11fd   :  { %1472 = vst [vmem:[#allocation11 + $0x8] sm:$0xff] %v1464_v43 }
0x1223   :  { %v1372_v52 = vpop.f32.mrf.mxu1 }
0x1224   :  { %v1373_v53 = vadd.f32 %v1372_v52, %v1343_v60 }
0x1226   :  { %v1441_v56 = vmul.f32 0.5, %v1373_v53 }
0x1228   :  { %1678 = vtanh.f32 %v1441_v56 }
0x1229   :  { %v1430_v50 = vpop.f32.mrf.mxu3 }
0x122a   :  { %v1431_v38 = vadd.f32 %v1430_v50, %v1401_v16  ;;  %v1346_v57 = vpop.f32.mrf.mxu0 }
0x122c   :  { %v1442_v51 = vmul.f32 0.5, %v1431_v38 }
0x122e   :  { %v1679_v0 = vpop.eup %1678  ;;  %1680 = vtanh.f32 %v1442_v51 }
0x122f   :  { %v1457_v4 = vmul.f32 0.5, %v1679_v0 }
0x1230   :  { %v1404_v62 = vpop.f32.mrf.mxu2 }
0x1231   :  { %v1465_v59 = vadd.f32 0.5, %v1457_v4 }
0x1233   :  { %1473 = vst [vmem:[#allocation11 + $0x10] sm:$0xff] %v1465_v59 }
0x1234   :  { %v1681_v41 = vpop.eup %1680 }
0x1235   :  { %v1458_v7 = vmul.f32 0.5, %v1681_v41 }
0x1237   :  { %v1466_v49 = vadd.f32 0.5, %v1458_v7 }
0x1239   :  { %1474 = vst [vmem:[#allocation11 + $0x18] sm:$0xff] %v1466_v49 }
0x1243   :  { %v1375_v13 = vpop.f32.mrf.mxu1 }
0x1244   :  { %v1376_v55 = vadd.f32 %v1375_v13, %v1346_v57 }
0x1246   :  { %v1443_v17 = vmul.f32 0.5, %v1376_v55 }
0x1248   :  { %1682 = vtanh.f32 %v1443_v17 }
0x1249   :  { %v1433_v58 = vpop.f32.mrf.mxu3 }
0x124a   :  { %v1434_v21 = vadd.f32 %v1433_v58, %v1404_v62 }
0x124b   :  { %v1378_v27 = vpop.f32.mrf.mxu1 }
0x124c   :  { %v1444_v22 = vmul.f32 0.5, %v1434_v21 }
0x124e   :  { %v1683_v25 = vpop.eup %1682  ;;  %1684 = vtanh.f32 %v1444_v22 }
0x124f   :  { %v1459_v46 = vmul.f32 0.5, %v1683_v25 }
0x1251   :  { %v1467_v15 = vadd.f32 0.5, %v1459_v46  ;;  %v1436_v30 = vpop.f32.mrf.mxu3 }
0x1252   :  { %v1349_v28 = vpop.f32.mrf.mxu0 }
0x1253   :  { %1475 = vst [vmem:[#allocation11 + $0x20] sm:$0xff] %v1467_v15  ;;  %v1379_v35 = vadd.f32 %v1378_v27, %v1349_v28 }
0x1254   :  { %v1685_v19 = vpop.eup %1684 }
0x1255   :  { %v1460_v26 = vmul.f32 0.5, %v1685_v19  ;;  %v1445_v29 = vmul.f32 0.5, %v1379_v35 }
0x1257   :  { %v1468_v3 = vadd.f32 0.5, %v1460_v26  ;;  %1686 = vtanh.f32 %v1445_v29 }
0x1258   :  { %v1407_v8 = vpop.f32.mrf.mxu2 }
0x1259   :  { %1476 = vst [vmem:[#allocation11 + $0x28] sm:$0xff] %v1468_v3  ;;  %v1437_v5 = vadd.f32 %v1436_v30, %v1407_v8 }
0x125b   :  { %v1446_v10 = vmul.f32 0.5, %v1437_v5 }
0x125d   :  { %v1687_v14 = vpop.eup %1686  ;;  %1688 = vtanh.f32 %v1446_v10 }
0x125e   :  { %v1461_v37 = vmul.f32 0.5, %v1687_v14 }
0x1260   :  { %v1469_v54 = vadd.f32 0.5, %v1461_v37 }
0x1262   :  { %1477 = vst [vmem:[#allocation11 + $0x30] sm:$0xff] %v1469_v54 }
0x1263   :  { %v1689_v39 = vpop.eup %1688 }
0x1264   :  { %v1462_v18 = vmul.f32 0.5, %v1689_v39 }
0x1266   :  { %v1470_v45 = vadd.f32 0.5, %v1462_v18 }
0x1268   :  { %1478 = vst [vmem:[#allocation11 + $0x38] sm:$0xff] %v1470_v45 }
0x1269   :  { %1491 = dma.vmem_to_hbm [thread:$0]  %s1484_s18, 1024, %s1486_s21, [#allocation5], %s1824_s13, %s1824_s13, %s1825_s14  }
0x126a   :  { %1816 = dma.done.wait [#allocation5], 1024  }
0x126b   :  { %1817 = vsyncadd [#allocation5], 4294966272 }
0x126c   :  { %1496 = vsyncpa [#allocation4], 1 }
0x126d   :  { %1497 = vsyncpa [#allocation7], 1 }
0x126e   :  { %1498 = vsyncpa [#allocation10], 1 }
0x126f   :  { %1499 = vsyncpa [#allocation5], 1 }

</bundles_post_ra>
